<compile_context>
chip_gen: v5e
topology: v5e:2x2
jax: 0.10.0
libtpu: 0.0.40
codegen_flags: <defaults>
</compile_context>

<pallas_src>
import jax
import jax.numpy as jnp
from jax import lax
from jax.experimental import pallas as pl
from jax.experimental.pallas import tpu as pltpu


def _row_policy_kernel(a_ref, s_ref, wa_ref, ws_ref, ba_ref, bs_ref,
                       woa_ref, wos_ref, b2_ref, out_ref):
    """One batch tile: fused two-branch MLP + first-occurrence argmax.

    a_ref  : (TB, Fa)   f32   addr-branch features (cast to bf16 in-kernel)
    s_ref  : (TB, Fs)   f32   stats-branch features
    wa_ref : (Fa, H)    bf16  addr-branch layer-1 weight
    ws_ref : (Fs, H)    bf16  stats-branch layer-1 weight
    ba_ref : (1, H)     f32
    bs_ref : (1, H)     f32
    woa_ref: (H, Cpad)  bf16  addr-branch head weight (class axis lane-padded)
    wos_ref: (H, Cpad)  bf16  stats-branch head weight
    b2_ref : (1, Cpad)  f32   (-1e9 on padded class columns)
    out_ref: (TB, 1)    int32 argmax indices
    """
    a = a_ref[...].astype(jnp.bfloat16)
    s = s_ref[...].astype(jnp.bfloat16)

    ha = jnp.maximum(
        jnp.dot(a, wa_ref[...], preferred_element_type=jnp.float32)
        + ba_ref[...], 0.0)
    hs = jnp.maximum(
        jnp.dot(s, ws_ref[...], preferred_element_type=jnp.float32)
        + bs_ref[...], 0.0)

    logits = (jnp.dot(ha.astype(jnp.bfloat16), woa_ref[...],
                      preferred_element_type=jnp.float32)
              + jnp.dot(hs.astype(jnp.bfloat16), wos_ref[...],
                        preferred_element_type=jnp.float32)
              + b2_ref[...])                               # (TB, Cpad) f32

    # argmax over classes with first-occurrence tie-break (torch semantics),
    # done directly in (TB, Cpad) layout (no transpose).
    cpad = logits.shape[1]
    max_val = jnp.max(logits, axis=1, keepdims=True)       # (TB, 1)
    cls = lax.broadcasted_iota(jnp.int32, logits.shape, 1)
    idx = jnp.min(jnp.where(logits == max_val, cls, cpad),
                  axis=1, keepdims=True)                   # (TB, 1)
    out_ref[...] = idx.astype(jnp.int32)


def _tensorcores_per_chip():
    """Heuristic: v7x has 2 TensorCores per chip, v5e/v6e have 1."""
    try:
        kind = jax.devices()[0].device_kind.lower()
    except Exception:
        return 1
    return 2 if "v7" in kind else 1


def _choose_tile(batch, n_tc):
    """One tile per TensorCore (grid-step overhead dominates at this size)."""
    tiles = max(int(n_tc), 1)
    tb = -(-batch // tiles)        # ceil
    tb = -(-tb // 8) * 8           # round up to sublane multiple
    return min(max(tb, 8), 2048)   # VMEM stays tiny well past this cap


def row_policy_inference(addr_window, stats_window, packed, *, tb=None):
    """argmax(joint_model(addr_window, stats_window).logits, dim=1)."""
    B = addr_window.shape[0]
    a = addr_window.reshape(B, -1)                      # (B, Fa) f32
    s = stats_window.reshape(B, -1)                     # (B, Fs) f32
    Fa, Fs = a.shape[1], s.shape[1]

    if tb is None:
        tb = _choose_tile(B, _tensorcores_per_chip())
    num_tiles = -(-B // tb)
    b_pad = num_tiles * tb
    if b_pad != B:
        a = jnp.pad(a, ((0, b_pad - B), (0, 0)))
        s = jnp.pad(s, ((0, b_pad - B), (0, 0)))

    H = packed["wa"].shape[1]
    Cpad = packed["woa"].shape[1]

    out = pl.pallas_call(
        _row_policy_kernel,
        out_shape=jax.ShapeDtypeStruct((b_pad, 1), jnp.int32),
        grid=(num_tiles,),
        in_specs=[
            pl.BlockSpec((tb, Fa), lambda i: (i, 0)),   # pipelined batch tiles
            pl.BlockSpec((tb, Fs), lambda i: (i, 0)),
            pl.BlockSpec((Fa, H), lambda i: (0, 0)),    # weights stay resident
            pl.BlockSpec((Fs, H), lambda i: (0, 0)),
            pl.BlockSpec((1, H), lambda i: (0, 0)),
            pl.BlockSpec((1, H), lambda i: (0, 0)),
            pl.BlockSpec((H, Cpad), lambda i: (0, 0)),
            pl.BlockSpec((H, Cpad), lambda i: (0, 0)),
            pl.BlockSpec((1, Cpad), lambda i: (0, 0)),
        ],
        out_specs=pl.BlockSpec((tb, 1), lambda i: (i, 0)),
        compiler_params=pltpu.CompilerParams(
            dimension_semantics=("parallel",)),          # 2x on v7x dual TCs
    )(a, s, packed["wa"], packed["ws"], packed["ba"], packed["bs"],
      packed["woa"], packed["wos"], packed["b2"])
    return out.reshape(-1)[:B]


# ---------------------------------------------------------------------------
# Synthetic joint-model parameters (branch form) + kernel-dtype packing
# ---------------------------------------------------------------------------
def _init_branch_params(key, fa, fs, hidden, n_classes):
    ks = jax.random.split(key, 5)
    return {
        "wa": jax.random.normal(ks[0], (fa, hidden), jnp.float32) / jnp.sqrt(fa),
        "ba": jnp.zeros((1, hidden), jnp.float32),
        "ws": jax.random.normal(ks[1], (fs, hidden), jnp.float32) / jnp.sqrt(fs),
        "bs": jnp.zeros((1, hidden), jnp.float32),
        "woa": jax.random.normal(ks[2], (hidden, n_classes), jnp.float32)
               / jnp.sqrt(2 * hidden),
        "wos": jax.random.normal(ks[3], (hidden, n_classes), jnp.float32)
               / jnp.sqrt(2 * hidden),
        "bo": jax.random.normal(ks[4], (1, n_classes), jnp.float32) * 0.01,
    }


def _pack_params(p, n_classes_pad):
    """Pad the class axis to lane width and pre-cast to kernel dtypes ONCE
    (bf16 MXU operands, f32 biases; padded class columns biased to -1e9)."""
    h, c = p["woa"].shape
    woa = jnp.zeros((h, n_classes_pad), jnp.float32).at[:, :c].set(p["woa"])
    wos = jnp.zeros((h, n_classes_pad), jnp.float32).at[:, :c].set(p["wos"])
    b2 = jnp.full((1, n_classes_pad), -1e9, jnp.float32).at[:, :c].set(p["bo"])
    return {
        "wa": p["wa"].astype(jnp.bfloat16),
        "ws": p["ws"].astype(jnp.bfloat16),
        "ba": p["ba"].astype(jnp.float32),
        "bs": p["bs"].astype(jnp.float32),
        "woa": woa.astype(jnp.bfloat16),
        "wos": wos.astype(jnp.bfloat16),
        "b2": b2,
    }


# ---------------------------------------------------------------------------
# References
# ---------------------------------------------------------------------------
def _reference_f32(addr_window, stats_window, p):
    B = addr_window.shape[0]
    a = addr_window.reshape(B, -1)
    s = stats_window.reshape(B, -1)
    ha = jnp.maximum(a @ p["wa"] + p["ba"], 0.0)
    hs = jnp.maximum(s @ p["ws"] + p["bs"], 0.0)
    logits = ha @ p["woa"] + hs @ p["wos"] + p["bo"]
    return jnp.argmax(logits, axis=1).astype(jnp.int32)


def _reference_split_bf16(addr_window, stats_window, packed):
    """Same split bf16 math as the kernel, in plain JAX."""
    B = addr_window.shape[0]
    a = addr_window.reshape(B, -1).astype(jnp.bfloat16)
    s = stats_window.reshape(B, -1).astype(jnp.bfloat16)
    ha = jnp.maximum(
        jnp.dot(a, packed["wa"], preferred_element_type=jnp.float32)
        + packed["ba"], 0.0)
    hs = jnp.maximum(
        jnp.dot(s, packed["ws"], preferred_element_type=jnp.float32)
        + packed["bs"], 0.0)
    logits = (jnp.dot(ha.astype(jnp.bfloat16), packed["woa"],
                      preferred_element_type=jnp.float32)
              + jnp.dot(hs.astype(jnp.bfloat16), packed["wos"],
                        preferred_element_type=jnp.float32)
              + packed["b2"])
    return jnp.argmax(logits, axis=1).astype(jnp.int32)


if __name__ == "__main__":
    # Module-consistent small shapes:
    #   addr_window : (B, S, Da) = (256, 8, 16) -> 128 addr features / row
    #   stats_window: (B, S, Ds) = (256, 8, 16) -> 128 stats features / row
    B, S, Da, Ds = 256, 8, 16, 16
    HIDDEN, N_CLASSES, N_CLASSES_PAD = 128, 3, 128

    key = jax.random.PRNGKey(0)
    k_addr, k_stats, k_params = jax.random.split(key, 3)
    addr_window = jax.random.normal(k_addr, (B, S, Da), jnp.float32)
    stats_window = jax.random.normal(k_stats, (B, S, Ds), jnp.float32)

    branch_params = _init_branch_params(k_params, S * Da, S * Ds,
                                        HIDDEN, N_CLASSES)
    packed = _pack_params(branch_params, N_CLASSES_PAD)

    out = row_policy_inference(addr_window, stats_window, packed)
    out = jax.block_until_ready(out)

    assert out.shape == (B,) and out.dtype == jnp.int32
    assert int(jnp.min(out)) >= 0 and int(jnp.max(out)) < N_CLASSES

    # Same split bf16 math in plain JAX: must agree except on (vanishingly
    # rare) exact near-ties caused by accumulation-order differences.
    ref_bf16 = _reference_split_bf16(addr_window, stats_window, packed)
    agree_bf16 = float(jnp.mean((out == ref_bf16).astype(jnp.float32)))
    assert agree_bf16 >= 0.995, agree_bf16

    # Full-precision two-branch reference: bf16 operands can flip argmax only
    # on rows whose top-2 logit gap is below bf16 noise, so compare agreement
    # fraction rather than exact equality.
    ref_f32 = _reference_f32(addr_window, stats_window, branch_params)
    agree_f32 = float(jnp.mean((out == ref_f32).astype(jnp.float32)))
    assert agree_f32 >= 0.95, agree_f32

    print("KERNEL_OK")
</pallas_src>

<mosaic_0001>
module attributes {stable_mosaic.version = 11 : i64} {
  func.func @_row_policy_kernel(%arg0: i32, %arg1: memref<256x128xf32, #tpu.memory_space<vmem>>, %arg2: memref<256x128xf32, #tpu.memory_space<vmem>>, %arg3: memref<128x128xbf16, #tpu.memory_space<vmem>>, %arg4: memref<128x128xbf16, #tpu.memory_space<vmem>>, %arg5: memref<1x128xf32, #tpu.memory_space<vmem>>, %arg6: memref<1x128xf32, #tpu.memory_space<vmem>>, %arg7: memref<128x128xbf16, #tpu.memory_space<vmem>>, %arg8: memref<128x128xbf16, #tpu.memory_space<vmem>>, %arg9: memref<1x128xf32, #tpu.memory_space<vmem>>, %arg10: memref<256x1xi32, #tpu.memory_space<vmem>>) attributes {dimension_semantics = [#tpu.dimension_semantics<parallel>], iteration_bounds = array<i64: 1>, scalar_prefetch = 0 : i64, scratch_operands = 0 : i64, tpu.core_type = #tpu.core_type<tc>, window_params = [{transform_indices = @transform_0, window_bounds = array<i64: 256, 128>}, {transform_indices = @transform_1, window_bounds = array<i64: 256, 128>}, {pipeline_mode = #tpu.pipeline_mode<synchronous>, transform_indices = @transform_2, window_bounds = array<i64: 128, 128>}, {pipeline_mode = #tpu.pipeline_mode<synchronous>, transform_indices = @transform_3, window_bounds = array<i64: 128, 128>}, {pipeline_mode = #tpu.pipeline_mode<synchronous>, transform_indices = @transform_4, window_bounds = array<i64: 1, 128>}, {pipeline_mode = #tpu.pipeline_mode<synchronous>, transform_indices = @transform_5, window_bounds = array<i64: 1, 128>}, {pipeline_mode = #tpu.pipeline_mode<synchronous>, transform_indices = @transform_6, window_bounds = array<i64: 128, 128>}, {pipeline_mode = #tpu.pipeline_mode<synchronous>, transform_indices = @transform_7, window_bounds = array<i64: 128, 128>}, {pipeline_mode = #tpu.pipeline_mode<synchronous>, transform_indices = @transform_8, window_bounds = array<i64: 1, 128>}, {transform_indices = @transform_9, window_bounds = array<i64: 256, 1>}]} {
    %c0 = arith.constant 0 : index
    %c0_0 = arith.constant 0 : index
    %0 = vector.load %arg1[%c0, %c0_0] : memref<256x128xf32, #tpu.memory_space<vmem>>, vector<256x128xf32>
    %1 = arith.truncf %0 : vector<256x128xf32> to vector<256x128xbf16>
    %c0_1 = arith.constant 0 : index
    %c0_2 = arith.constant 0 : index
    %2 = vector.load %arg2[%c0_1, %c0_2] : memref<256x128xf32, #tpu.memory_space<vmem>>, vector<256x128xf32>
    %3 = arith.truncf %2 : vector<256x128xf32> to vector<256x128xbf16>
    %c0_3 = arith.constant 0 : index
    %c0_4 = arith.constant 0 : index
    %4 = vector.load %arg3[%c0_3, %c0_4] : memref<128x128xbf16, #tpu.memory_space<vmem>>, vector<128x128xbf16>
    %cst = arith.constant dense<0.000000e+00> : vector<256x128xf32>
    %5 = tpu.matmul %1, %4, %cst {dimension_numbers = #tpu.dot_dimension_numbers<[1], [0], [0], [1], [0, 0, 1, 1], [], []>} : vector<256x128xbf16>, vector<128x128xbf16>, vector<256x128xf32> -> vector<256x128xf32>
    %c0_5 = arith.constant 0 : index
    %c0_6 = arith.constant 0 : index
    %6 = vector.load %arg5[%c0_5, %c0_6] : memref<1x128xf32, #tpu.memory_space<vmem>>, vector<1x128xf32>
    %7 = vector.broadcast %6 : vector<1x128xf32> to vector<256x128xf32>
    %8 = arith.addf %5, %7 : vector<256x128xf32>
    %cst_7 = arith.constant 0.000000e+00 : f32
    %9 = vector.broadcast %cst_7 : f32 to vector<256x128xf32>
    %10 = arith.maximumf %8, %9 : vector<256x128xf32>
    %c0_8 = arith.constant 0 : index
    %c0_9 = arith.constant 0 : index
    %11 = vector.load %arg4[%c0_8, %c0_9] : memref<128x128xbf16, #tpu.memory_space<vmem>>, vector<128x128xbf16>
    %cst_10 = arith.constant dense<0.000000e+00> : vector<256x128xf32>
    %12 = tpu.matmul %3, %11, %cst_10 {dimension_numbers = #tpu.dot_dimension_numbers<[1], [0], [0], [1], [0, 0, 1, 1], [], []>} : vector<256x128xbf16>, vector<128x128xbf16>, vector<256x128xf32> -> vector<256x128xf32>
    %c0_11 = arith.constant 0 : index
    %c0_12 = arith.constant 0 : index
    %13 = vector.load %arg6[%c0_11, %c0_12] : memref<1x128xf32, #tpu.memory_space<vmem>>, vector<1x128xf32>
    %14 = vector.broadcast %13 : vector<1x128xf32> to vector<256x128xf32>
    %15 = arith.addf %12, %14 : vector<256x128xf32>
    %cst_13 = arith.constant 0.000000e+00 : f32
    %16 = vector.broadcast %cst_13 : f32 to vector<256x128xf32>
    %17 = arith.maximumf %15, %16 : vector<256x128xf32>
    %18 = arith.truncf %10 : vector<256x128xf32> to vector<256x128xbf16>
    %c0_14 = arith.constant 0 : index
    %c0_15 = arith.constant 0 : index
    %19 = vector.load %arg7[%c0_14, %c0_15] : memref<128x128xbf16, #tpu.memory_space<vmem>>, vector<128x128xbf16>
    %cst_16 = arith.constant dense<0.000000e+00> : vector<256x128xf32>
    %20 = tpu.matmul %18, %19, %cst_16 {dimension_numbers = #tpu.dot_dimension_numbers<[1], [0], [0], [1], [0, 0, 1, 1], [], []>} : vector<256x128xbf16>, vector<128x128xbf16>, vector<256x128xf32> -> vector<256x128xf32>
    %21 = arith.truncf %17 : vector<256x128xf32> to vector<256x128xbf16>
    %c0_17 = arith.constant 0 : index
    %c0_18 = arith.constant 0 : index
    %22 = vector.load %arg8[%c0_17, %c0_18] : memref<128x128xbf16, #tpu.memory_space<vmem>>, vector<128x128xbf16>
    %cst_19 = arith.constant dense<0.000000e+00> : vector<256x128xf32>
    %23 = tpu.matmul %21, %22, %cst_19 {dimension_numbers = #tpu.dot_dimension_numbers<[1], [0], [0], [1], [0, 0, 1, 1], [], []>} : vector<256x128xbf16>, vector<128x128xbf16>, vector<256x128xf32> -> vector<256x128xf32>
    %24 = arith.addf %20, %23 : vector<256x128xf32>
    %c0_20 = arith.constant 0 : index
    %c0_21 = arith.constant 0 : index
    %25 = vector.load %arg9[%c0_20, %c0_21] : memref<1x128xf32, #tpu.memory_space<vmem>>, vector<1x128xf32>
    %26 = vector.broadcast %25 : vector<1x128xf32> to vector<256x128xf32>
    %27 = arith.addf %24, %26 : vector<256x128xf32>
    %cst_22 = arith.constant dense<0xFF800000> : vector<256xf32>
    %28 = vector.multi_reduction <maximumf>, %27, %cst_22 [1] : vector<256x128xf32> to vector<256xf32>
    %29 = vector.shape_cast %28 : vector<256xf32> to vector<256x1xf32>
    %30 = tpu.iota {dimensions = array<i32: 1>} : vector<256x128xi32>
    %31 = vector.broadcast %29 : vector<256x1xf32> to vector<256x128xf32>
    %32 = arith.cmpf oeq, %27, %31 : vector<256x128xf32>
    %c128_i32 = arith.constant 128 : i32
    %33 = vector.broadcast %c128_i32 : i32 to vector<256x128xi32>
    %34 = arith.select %32, %30, %33 : vector<256x128xi1>, vector<256x128xi32>
    %cst_23 = arith.constant dense<2147483647> : vector<256xi32>
    %35 = vector.multi_reduction <minsi>, %34, %cst_23 [1] : vector<256x128xi32> to vector<256xi32>
    %36 = vector.shape_cast %35 : vector<256xi32> to vector<256x1xi32>
    %c0_24 = arith.constant 0 : index
    %c0_25 = arith.constant 0 : index
    %37 = vector.load %arg10[%c0_24, %c0_25] : memref<256x1xi32, #tpu.memory_space<vmem>>, vector<256x1xi32>
    tpu.vector_store %arg10[%c0_24, %c0_25], %36 {strides = array<i32>} : memref<256x1xi32, #tpu.memory_space<vmem>>, vector<256x1xi32>,
    return
  }
  func.func @transform_0(%arg0: i32) -> (i32, i32) {
    %c0_i32 = arith.constant 0 : i32
    %c0_i32_0 = arith.constant 0 : i32
    return %arg0, %c0_i32 : i32, i32
  }
  func.func @transform_1(%arg0: i32) -> (i32, i32) {
    %c0_i32 = arith.constant 0 : i32
    %c0_i32_0 = arith.constant 0 : i32
    return %arg0, %c0_i32 : i32, i32
  }
  func.func @transform_2(%arg0: i32) -> (i32, i32) {
    %c0_i32 = arith.constant 0 : i32
    %c0_i32_0 = arith.constant 0 : i32
    %c0_i32_1 = arith.constant 0 : i32
    return %c0_i32, %c0_i32_0 : i32, i32
  }
  func.func @transform_3(%arg0: i32) -> (i32, i32) {
    %c0_i32 = arith.constant 0 : i32
    %c0_i32_0 = arith.constant 0 : i32
    %c0_i32_1 = arith.constant 0 : i32
    return %c0_i32, %c0_i32_0 : i32, i32
  }
  func.func @transform_4(%arg0: i32) -> (i32, i32) {
    %c0_i32 = arith.constant 0 : i32
    %c0_i32_0 = arith.constant 0 : i32
    %c0_i32_1 = arith.constant 0 : i32
    return %c0_i32, %c0_i32_0 : i32, i32
  }
  func.func @transform_5(%arg0: i32) -> (i32, i32) {
    %c0_i32 = arith.constant 0 : i32
    %c0_i32_0 = arith.constant 0 : i32
    %c0_i32_1 = arith.constant 0 : i32
    return %c0_i32, %c0_i32_0 : i32, i32
  }
  func.func @transform_6(%arg0: i32) -> (i32, i32) {
    %c0_i32 = arith.constant 0 : i32
    %c0_i32_0 = arith.constant 0 : i32
    %c0_i32_1 = arith.constant 0 : i32
    return %c0_i32, %c0_i32_0 : i32, i32
  }
  func.func @transform_7(%arg0: i32) -> (i32, i32) {
    %c0_i32 = arith.constant 0 : i32
    %c0_i32_0 = arith.constant 0 : i32
    %c0_i32_1 = arith.constant 0 : i32
    return %c0_i32, %c0_i32_0 : i32, i32
  }
  func.func @transform_8(%arg0: i32) -> (i32, i32) {
    %c0_i32 = arith.constant 0 : i32
    %c0_i32_0 = arith.constant 0 : i32
    %c0_i32_1 = arith.constant 0 : i32
    return %c0_i32, %c0_i32_0 : i32, i32
  }
  func.func @transform_9(%arg0: i32) -> (i32, i32) {
    %c0_i32 = arith.constant 0 : i32
    %c0_i32_0 = arith.constant 0 : i32
    return %arg0, %c0_i32 : i32, i32
  }
}

</mosaic_0001>

<bundles_post_ra>
// kernel: tpu_custom_call.1
= control target key start
LH: loop header
LB: loop body
LE: loop exit
PB: predicated region body
PF: predicated region fallthrough
CT: control target
= control target key end

     0   :  { %14 = vsyncpa [#allocation3], 0  ;;  %s2781_s0 = inlined_call_operand.hbm [shape: f32[256,128], index: 0, kind: input, shape index: {}]   ;;  %s2782_s1 = inlined_call_operand.hbm [shape: f32[256,128], index: 1, kind: input, shape index: {}]   ;;  %s2783_s2 = inlined_call_operand.hbm [shape: bf16[128,128], index: 2, kind: input, shape index: {}]   ;;  %s2784_s3 = inlined_call_operand.hbm [shape: bf16[128,128], index: 3, kind: input, shape index: {}]   ;;  %s2785_s4 = inlined_call_operand.vmem [shape: f32[1,128], index: 4, kind: input, shape index: {}]   ;;  %s2786_s5 = inlined_call_operand.vmem [shape: f32[1,128], index: 5, kind: input, shape index: {}]   ;;  %s2787_s6 = inlined_call_operand.hbm [shape: bf16[128,128], index: 6, kind: input, shape index: {}]   ;;  %s2788_s7 = inlined_call_operand.hbm [shape: bf16[128,128], index: 7, kind: input, shape index: {}]   ;;  %s2789_s8 = inlined_call_operand.vmem [shape: f32[1,128], index: 8, kind: input, shape index: {}]   ;;  %s2790_s9 = inlined_call_operand.vmem [shape: s32[256,1], index: 9, kind: output, shape index: {}]  }
   0x1   :  { %15 = vsyncpa [#allocation5], 0 }
   0x2   :  { %16 = vsyncpa [#allocation8], 0 }
   0x3   :  { %17 = vsyncpa [#allocation11], 0  ;;  %s35_s11 = sshll.u32 %s2782_s1, 4  ;;  %s1918_s12 = smov [#allocation4]   ;;  %s36_s11 = int_to_ptr.hbm [resolvable:$true] %s35_s11 }
   0x4   :  { %s37_s13 = sshll.u32 %s1918_s12, 4  ;;  %s1919_s14 = smov 128   ;;  %s38_s13 = int_to_ptr.vmem [resolvable:$true] %s37_s13 }
   0x5   :  { %s1920_s15 = smov 8   ;;  %s61_s18 = sshll.u32 %s2784_s3, 4  ;;  %s62_s18 = int_to_ptr.hbm [resolvable:$true] %s61_s18 }
   0x6   :  { %43 = dma.hbm_to_vmem [thread:$0]  %s36_s11, 4096, %s38_s13, [#allocation5], %s1919_s14, %s1919_s14, %s1920_s15  }
   0x7   :  { %s1921_s19 = smov [#allocation7]   ;;  %s22_s23 = sshll.u32 %s2781_s0, 4  ;;  %s23_s23 = int_to_ptr.hbm [resolvable:$true] %s22_s23 }
   0x8   :  { %s63_s20 = sshll.u32 %s1921_s19, 4  ;;  %s1922_s1 = smov 64   ;;  %s64_s20 = int_to_ptr.vmem [resolvable:$true] %s63_s20 }
   0x9   :  { %s1923_s24 = smov 4   ;;  %s48_s27 = sshll.u32 %s2783_s2, 4  ;;  %s49_s27 = int_to_ptr.hbm [resolvable:$true] %s48_s27 }
   0xa   :  { %69 = dma.hbm_to_vmem [thread:$0]  %s62_s18, 1024, %s64_s20, [#allocation8], %s1922_s1, %s1922_s1, %s1923_s24  }
   0xb   :  { %s1924_s28 = smov [#allocation2]   ;;  %s1925_s3 = smov [#allocation6]  }
   0xc   :  { %s24_s29 = sshll.u32 %s1924_s28, 4  ;;  %s50_s30 = sshll.u32 %s1925_s3, 4  ;;  %s25_s29 = int_to_ptr.vmem [resolvable:$true] %s24_s29  ;;  %s51_s30 = int_to_ptr.vmem [resolvable:$true] %s50_s30 }
   0xd   :  { %30 = dma.hbm_to_vmem [thread:$0]  %s23_s23, 4096, %s25_s29, [#allocation3], %s1919_s14, %s1919_s14, %s1920_s15  }
   0xe   :  { %s78_s0 = sshll.u32 %s2787_s6, 4  ;;  %s91_s16 = sshll.u32 %s2788_s7, 4  ;;  %s79_s0 = int_to_ptr.hbm [resolvable:$true] %s78_s0  ;;  %s92_s16 = int_to_ptr.hbm [resolvable:$true] %s91_s16 }
   0xf   :  { %56 = dma.hbm_to_vmem [thread:$0]  %s49_s27, 1024, %s51_s30, [#allocation5], %s1922_s1, %s1922_s1, %s1923_s24  }
  0x10   :  { %s1926_s17 = smov [#allocation9]   ;;  %s1927_s18 = smov [#allocation10]  }
  0x11   :  { %s80_s2 = sshll.u32 %s1926_s17, 4  ;;  %s93_s14 = sshll.u32 %s1927_s18, 4  ;;  %s81_s2 = int_to_ptr.vmem [resolvable:$true] %s80_s2  ;;  %s94_s14 = int_to_ptr.vmem [resolvable:$true] %s93_s14 }
  0x12   :  { %86 = dma.hbm_to_vmem [thread:$0]  %s79_s0, 1024, %s81_s2, [#allocation8], %s1922_s1, %s1922_s1, %s1923_s24  }
  0x13   :  { %99 = dma.hbm_to_vmem [thread:$0]  %s92_s16, 1024, %s94_s14, [#allocation11], %s1922_s1, %s1922_s1, %s1923_s24  }
  0x14   :  { %1910 = dma.done.wait [#allocation3], 4096  }
  0x15   :  { %1911 = vsyncadd [#allocation3], 4294963200 }
  0x16   :  { %1912 = dma.done.wait [#allocation5], 5120  }
  0x17   :  { %1913 = vsyncadd [#allocation5], 4294962176 }
  0x18   :  { %1914 = dma.done.wait [#allocation8], 2048  }
  0x19   :  { %1915 = vsyncadd [#allocation8], 4294965248 }
  0x1a   :  { %1916 = dma.done.wait [#allocation11], 1024  }
  0x1b   :  { %1917 = vsyncadd [#allocation11], 4294966272  ;;  %v1728_v0 = vld [vmem:[#allocation6 + $0x38] sm:$0xff]  ;;  %v1727_v2 = vld [vmem:[#allocation6 + $0x30] sm:$0xff] }
  0x1c   :  { %v1736_v1 = vld [vmem:[#allocation7 + $0x38] sm:$0xff]  ;;  %290 = vmatpush.bf16.msra.mxu0 %v1728_v0  ;;  %v1735_v3 = vld [vmem:[#allocation7 + $0x30] sm:$0xff]  ;;  %v1726_v4 = vld [vmem:[#allocation6 + $0x28] sm:$0xff] }
  0x1d   :  { %479 = vmatpush.bf16.msra.mxu1 %v1736_v1  ;;  %v1734_v5 = vld [vmem:[#allocation7 + $0x28] sm:$0xff]  ;;  %v1725_v6 = vld [vmem:[#allocation6 + $0x20] sm:$0xff]  ;;  %v1724_v8 = vld [vmem:[#allocation6 + $0x18] sm:$0xff] }
  0x1e   :  { %v1733_v7 = vld [vmem:[#allocation7 + $0x20] sm:$0xff]  ;;  %v1732_v9 = vld [vmem:[#allocation7 + $0x18] sm:$0xff]  ;;  %v1723_v10 = vld [vmem:[#allocation6 + $0x10] sm:$0xff] }
  0x1f   :  { %v1731_v11 = vld [vmem:[#allocation7 + $0x10] sm:$0xff]  ;;  %v1722_v12 = vld [vmem:[#allocation6 + $0x8] sm:$0xff]  ;;  %v1721_v14 = vld [vmem:[#allocation6] sm:$0xff] }
  0x20   :  { %291 = vmatpush.bf16.msra.mxu0 %v1727_v2  ;;  %v1730_v13 = vld [vmem:[#allocation7 + $0x8] sm:$0xff]  ;;  %v1729_v15 = vld [vmem:[#allocation7] sm:$0xff]  ;;  %v128_v22 = vld [vmem:[#allocation2 + $0x10] sm:$0xff] }
  0x21   :  { %480 = vmatpush.bf16.msra.mxu1 %v1735_v3  ;;  %v126_v16 = vld [vmem:[#allocation2] sm:$0xff]  ;;  %v127_v17 = vld [vmem:[#allocation2 + $0x8] sm:$0xff]  ;;  %v129_v23 = vld [vmem:[#allocation2 + $0x18] sm:$0xff] }
  0x22   :  { %v174_v18 = vld [vmem:[#allocation4] sm:$0xff]  ;;  %v175_v19 = vld [vmem:[#allocation4 + $0x8] sm:$0xff]  ;;  %v158_v20 = vpack.c.bf16 %v127_v17, %v126_v16  ;;  %v176_v24 = vld [vmem:[#allocation4 + $0x10] sm:$0xff]  ;;  %v159_v26 = vpack.c.bf16 %v129_v23, %v128_v22 }
  0x23   :  { %v206_v21 = vpack.c.bf16 %v175_v19, %v174_v18  ;;  %v177_v25 = vld [vmem:[#allocation4 + $0x18] sm:$0xff]  ;;  %v130_v28 = vld [vmem:[#allocation2 + $0x20] sm:$0xff]  ;;  %v131_v29 = vld [vmem:[#allocation2 + $0x28] sm:$0xff] }
  0x24   :  { %292 = vmatpush.bf16.msra.mxu0 %v1726_v4  ;;  %v207_v27 = vpack.c.bf16 %v177_v25, %v176_v24  ;;  %v178_v30 = vld [vmem:[#allocation4 + $0x20] sm:$0xff]  ;;  %v179_v31 = vld [vmem:[#allocation4 + $0x28] sm:$0xff]  ;;  %v160_v32 = vpack.c.bf16 %v131_v29, %v130_v28  ;;  %v132_v34 = vld [vmem:[#allocation2 + $0x30] sm:$0xff] }
  0x25   :  { %481 = vmatpush.bf16.msra.mxu1 %v1734_v5  ;;  %v208_v33 = vpack.c.bf16 %v179_v31, %v178_v30  ;;  %v133_v35 = vld [vmem:[#allocation2 + $0x38] sm:$0xff]  ;;  %v180_v36 = vld [vmem:[#allocation4 + $0x30] sm:$0xff]  ;;  %v134_v40 = vld [vmem:[#allocation2 + $0x40] sm:$0xff] }
  0x26   :  { %v181_v37 = vld [vmem:[#allocation4 + $0x38] sm:$0xff]  ;;  %v161_v38 = vpack.c.bf16 %v133_v35, %v132_v34  ;;  %v135_v41 = vld [vmem:[#allocation2 + $0x48] sm:$0xff]  ;;  %v182_v42 = vld [vmem:[#allocation4 + $0x40] sm:$0xff] }
  0x27   :  { %v209_v39 = vpack.c.bf16 %v181_v37, %v180_v36  ;;  %v183_v43 = vld [vmem:[#allocation4 + $0x48] sm:$0xff]  ;;  %v162_v44 = vpack.c.bf16 %v135_v41, %v134_v40  ;;  %v1752_v46 = vld [vmem:[#allocation10 + $0x38] sm:$0xff]  ;;  %v136_v48 = vld [vmem:[#allocation2 + $0x50] sm:$0xff] }
  0x28   :  { %293 = vmatpush.bf16.msra.mxu0 %v1725_v6  ;;  %v210_v45 = vpack.c.bf16 %v183_v43, %v182_v42  ;;  %v1744_v47 = vld [vmem:[#allocation9 + $0x38] sm:$0xff]  ;;  %712 = vmatpush.bf16.msra.mxu2 %v1752_v46  ;;  %v184_v50 = vld [vmem:[#allocation4 + $0x50] sm:$0xff]  ;;  %v1750_v56 = vld [vmem:[#allocation10 + $0x28] sm:$0xff] }
  0x29   :  { %482 = vmatpush.bf16.msra.mxu1 %v1733_v7  ;;  %849 = vmatpush.bf16.msra.mxu3 %v1744_v47  ;;  %v137_v49 = vld [vmem:[#allocation2 + $0x58] sm:$0xff]  ;;  %v1751_v54 = vld [vmem:[#allocation10 + $0x30] sm:$0xff]  ;;  %v1742_v57 = vld [vmem:[#allocation9 + $0x28] sm:$0xff] }
  0x2a   :  { %v185_v51 = vld [vmem:[#allocation4 + $0x58] sm:$0xff]  ;;  %v163_v52 = vpack.c.bf16 %v137_v49, %v136_v48  ;;  %v1743_v55 = vld [vmem:[#allocation9 + $0x30] sm:$0xff]  ;;  %v1749_v58 = vld [vmem:[#allocation10 + $0x20] sm:$0xff] }
  0x2b   :  { %v211_v53 = vpack.c.bf16 %v185_v51, %v184_v50  ;;  %v1741_v59 = vld [vmem:[#allocation9 + $0x20] sm:$0xff]  ;;  %v139_v61 = vld [vmem:[#allocation2 + $0x68] sm:$0xff]  ;;  %v1748_v0 = vld [vmem:[#allocation10 + $0x18] sm:$0xff] }
  0x2c   :  { %294 = vmatpush.bf16.msra.mxu0 %v1724_v8  ;;  %713 = vmatpush.bf16.msra.mxu2 %v1751_v54  ;;  %v138_v60 = vld [vmem:[#allocation2 + $0x60] sm:$0xff]  ;;  %v187_v63 = vld [vmem:[#allocation4 + $0x68] sm:$0xff]  ;;  %v1740_v1 = vld [vmem:[#allocation9 + $0x18] sm:$0xff] }
  0x2d   :  { %483 = vmatpush.bf16.msra.mxu1 %v1732_v9  ;;  %850 = vmatpush.bf16.msra.mxu3 %v1743_v55  ;;  %v186_v62 = vld [vmem:[#allocation4 + $0x60] sm:$0xff]  ;;  %v164_v2 = vpack.c.bf16 %v139_v61, %v138_v60  ;;  %v1747_v4 = vld [vmem:[#allocation10 + $0x10] sm:$0xff]  ;;  %v1746_v6 = vld [vmem:[#allocation10 + $0x8] sm:$0xff] }
  0x2e   :  { %v212_v3 = vpack.c.bf16 %v187_v63, %v186_v62  ;;  %v1739_v5 = vld [vmem:[#allocation9 + $0x10] sm:$0xff]  ;;  %v1738_v7 = vld [vmem:[#allocation9 + $0x8] sm:$0xff]  ;;  %v1745_v8 = vld [vmem:[#allocation10] sm:$0xff] }
  0x2f   :  { %v1737_v9 = vld [vmem:[#allocation9] sm:$0xff]  ;;  %v143_v17 = vld [vmem:[#allocation2 + $0x88] sm:$0xff]  ;;  %v144_v36 = vld [vmem:[#allocation2 + $0x90] sm:$0xff] }
  0x30   :  { %295 = vmatpush.bf16.msra.mxu0 %v1723_v10  ;;  %714 = vmatpush.bf16.msra.mxu2 %v1750_v56  ;;  %v140_v10 = vld [vmem:[#allocation2 + $0x70] sm:$0xff]  ;;  %v142_v16 = vld [vmem:[#allocation2 + $0x80] sm:$0xff]  ;;  %v191_v19 = vld [vmem:[#allocation4 + $0x88] sm:$0xff] }
  0x31   :  { %484 = vmatpush.bf16.msra.mxu1 %v1731_v11  ;;  %851 = vmatpush.bf16.msra.mxu3 %v1742_v57  ;;  %v141_v11 = vld [vmem:[#allocation2 + $0x78] sm:$0xff]  ;;  %v190_v18 = vld [vmem:[#allocation4 + $0x80] sm:$0xff]  ;;  %v147_v57 = vld [vmem:[#allocation2 + $0xa8] sm:$0xff] }
  0x32   :  { %v1999_v24 = vld [vmem:[%s2785_s4] ss:$0 sm:$0xff]  ;;  %v145_v37 = vld [vmem:[#allocation2 + $0x98] sm:$0xff] }
  0x33   :  { %v2004_v25 = vld [vmem:[%s2786_s5] ss:$0 sm:$0xff]  ;;  %v167_v42 = vpack.c.bf16 %v145_v37, %v144_v36  ;;  %v199_v37 = vld [vmem:[#allocation4 + $0xc8] sm:$0xff] }
  0x34   :  { %296 = vmatpush.bf16.msra.mxu0 %v1722_v12  ;;  %715 = vmatpush.bf16.msra.mxu2 %v1749_v58  ;;  %v188_v12 = vld [vmem:[#allocation4 + $0x70] sm:$0xff]  ;;  %v146_v56 = vld [vmem:[#allocation2 + $0xa0] sm:$0xff] }
  0x35   :  { %485 = vmatpush.bf16.msra.mxu1 %v1730_v13  ;;  %852 = vmatpush.bf16.msra.mxu3 %v1741_v59  ;;  %v189_v13 = vld [vmem:[#allocation4 + $0x78] sm:$0xff]  ;;  %v194_v58 = vld [vmem:[#allocation4 + $0xa0] sm:$0xff]  ;;  %v195_v59 = vld [vmem:[#allocation4 + $0xa8] sm:$0xff]  ;;  %v168_v62 = vpack.c.bf16 %v147_v57, %v146_v56 }
  0x36   :  { %v216_v63 = vpack.c.bf16 %v195_v59, %v194_v58  ;;  %v198_v36 = vld [vmem:[#allocation4 + $0xc0] sm:$0xff]  ;;  %v200_v56 = vld [vmem:[#allocation4 + $0xd0] sm:$0xff]  ;;  %v201_v57 = vld [vmem:[#allocation4 + $0xd8] sm:$0xff] }
  0x38   :  { %297 = vmatpush.bf16.msra.mxu0 %v1721_v14  ;;  %716 = vmatpush.bf16.msra.mxu2 %v1748_v0  ;;  %v165_v14 = vpack.c.bf16 %v141_v11, %v140_v10 }
  0x39   :  { %486 = vmatpush.bf16.msra.mxu1 %v1729_v15  ;;  %853 = vmatpush.bf16.msra.mxu3 %v1740_v1  ;;  %v213_v15 = vpack.c.bf16 %v189_v13, %v188_v12  ;;  %v148_v12 = vld [vmem:[#allocation2 + $0xb0] sm:$0xff]  ;;  %v149_v13 = vld [vmem:[#allocation2 + $0xb8] sm:$0xff] }
  0x3b   :  { %298 = vmatmul.bf16.vlgmr.msra.gmra.mxu0 %v158_v20  ;;  %v166_v20 = vpack.c.bf16 %v143_v17, %v142_v16 }
  0x3c   :  { %487 = vmatmul.bf16.vlgmr.msra.gmra.mxu1 %v206_v21  ;;  %717 = vmatpush.bf16.msra.mxu2 %v1747_v4  ;;  %v214_v21 = vpack.c.bf16 %v191_v19, %v190_v18  ;;  %v169_v18 = vpack.c.bf16 %v149_v13, %v148_v12  ;;  %v202_v12 = vld [vmem:[#allocation4 + $0xe0] sm:$0xff]  ;;  %v203_v13 = vld [vmem:[#allocation4 + $0xe8] sm:$0xff] }
  0x3d   :  { %854 = vmatpush.bf16.msra.mxu3 %v1739_v5 }
  0x40   :  { %718 = vmatpush.bf16.msra.mxu2 %v1746_v6 }
  0x41   :  { %855 = vmatpush.bf16.msra.mxu3 %v1738_v7 }
  0x44   :  { %719 = vmatpush.bf16.msra.mxu2 %v1745_v8 }
  0x45   :  { %856 = vmatpush.bf16.msra.mxu3 %v1737_v9 }
  0x4b   :  { %303 = vmatmul.bf16.gmra.mxu0 %v159_v26 }
  0x4c   :  { %492 = vmatmul.bf16.gmra.mxu1 %v207_v27 }
  0x5b   :  { %308 = vmatmul.bf16.gmra.mxu0 %v160_v32 }
  0x5c   :  { %497 = vmatmul.bf16.gmra.mxu1 %v208_v33 }
  0x6b   :  { %313 = vmatmul.bf16.gmra.mxu0 %v161_v38  ;;  %v192_v38 = vld [vmem:[#allocation4 + $0x90] sm:$0xff] }
  0x6c   :  { %502 = vmatmul.bf16.gmra.mxu1 %v209_v39  ;;  %v193_v39 = vld [vmem:[#allocation4 + $0x98] sm:$0xff] }
  0x6d   :  { %v215_v43 = vpack.c.bf16 %v193_v39, %v192_v38 }
  0x7b   :  { %318 = vmatmul.bf16.gmra.mxu0 %v162_v44 }
  0x7c   :  { %507 = vmatmul.bf16.gmra.mxu1 %v210_v45 }
  0x8b   :  { %323 = vmatmul.bf16.gmra.mxu0 %v163_v52 }
  0x8c   :  { %512 = vmatmul.bf16.gmra.mxu1 %v211_v53 }
  0x9b   :  { %328 = vmatmul.bf16.gmra.mxu0 %v164_v2 }
  0x9c   :  { %517 = vmatmul.bf16.gmra.mxu1 %v212_v3 }
  0xab   :  { %333 = vmatmul.bf16.gmra.mxu0 %v165_v14  ;;  %v196_v14 = vld [vmem:[#allocation4 + $0xb0] sm:$0xff] }
  0xac   :  { %522 = vmatmul.bf16.gmra.mxu1 %v213_v15  ;;  %v197_v15 = vld [vmem:[#allocation4 + $0xb8] sm:$0xff] }
  0xad   :  { %v217_v19 = vpack.c.bf16 %v197_v15, %v196_v14 }
  0xb8   :  { %v299_v22 = vpop.f32.mrf.mxu0 }
  0xb9   :  { %v488_v23 = vpop.f32.mrf.mxu1  ;;  %v300_v26 = vadd.f32 %v1999_v24, %v299_v22 }
  0xba   :  { %v489_v27 = vadd.f32 %v2004_v25, %v488_v23 }
  0xbb   :  { %338 = vmatmul.bf16.gmra.mxu0 %v166_v20  ;;  %v379_v32 = vmax.f32 %v300_v26, 0.0 }
  0xbc   :  { %527 = vmatmul.bf16.gmra.mxu1 %v214_v21  ;;  %v568_v33 = vmax.f32 %v489_v27, 0.0 }
  0xc0   :  { %v301_v28 = vpop.f32.mrf.mxu0 }
  0xc1   :  { %v490_v29 = vpop.f32.mrf.mxu1  ;;  %v302_v30 = vadd.f32 %v1999_v24, %v301_v28 }
  0xc2   :  { %v491_v31 = vadd.f32 %v2004_v25, %v490_v29 }
  0xc3   :  { %v380_v34 = vmax.f32 %v302_v30, 0.0 }
  0xc4   :  { %v569_v35 = vmax.f32 %v491_v31, 0.0 }
  0xc5   :  { %v600_v41 = vpack.c.bf16 %v380_v34, %v379_v32  ;;  %v150_v34 = vld [vmem:[#allocation2 + $0xc0] sm:$0xff] }
  0xc6   :  { %v632_v40 = vpack.c.bf16 %v569_v35, %v568_v33  ;;  %v151_v35 = vld [vmem:[#allocation2 + $0xc8] sm:$0xff] }
  0xc7   :  { %857 = vmatmul.bf16.vlgmr.msra.gmra.mxu3 %v600_v41  ;;  %v218_v41 = vpack.c.bf16 %v199_v37, %v198_v36 }
  0xc8   :  { %720 = vmatmul.bf16.vlgmr.msra.gmra.mxu2 %v632_v40  ;;  %v304_v44 = vpop.f32.mrf.mxu0  ;;  %v170_v40 = vpack.c.bf16 %v151_v35, %v150_v34  ;;  %v204_v34 = vld [vmem:[#allocation4 + $0xf0] sm:$0xff]  ;;  %v205_v35 = vld [vmem:[#allocation4 + $0xf8] sm:$0xff] }
  0xc9   :  { %v493_v45 = vpop.f32.mrf.mxu1  ;;  %v305_v46 = vadd.f32 %v1999_v24, %v304_v44 }
  0xca   :  { %v494_v47 = vadd.f32 %v2004_v25, %v493_v45 }
  0xcb   :  { %343 = vmatmul.bf16.gmra.mxu0 %v167_v42  ;;  %v381_v52 = vmax.f32 %v305_v46, 0.0 }
  0xcc   :  { %532 = vmatmul.bf16.gmra.mxu1 %v215_v43  ;;  %v570_v53 = vmax.f32 %v494_v47, 0.0 }
  0xd0   :  { %v306_v48 = vpop.f32.mrf.mxu0 }
  0xd1   :  { %v495_v49 = vpop.f32.mrf.mxu1  ;;  %v307_v50 = vadd.f32 %v1999_v24, %v306_v48 }
  0xd2   :  { %v496_v51 = vadd.f32 %v2004_v25, %v495_v49 }
  0xd3   :  { %v382_v54 = vmax.f32 %v307_v50, 0.0 }
  0xd4   :  { %v571_v55 = vmax.f32 %v496_v51, 0.0 }
  0xd5   :  { %v601_v61 = vpack.c.bf16 %v382_v54, %v381_v52  ;;  %v152_v54 = vld [vmem:[#allocation2 + $0xd0] sm:$0xff] }
  0xd6   :  { %v633_v60 = vpack.c.bf16 %v571_v55, %v570_v53  ;;  %v153_v55 = vld [vmem:[#allocation2 + $0xd8] sm:$0xff] }
  0xd7   :  { %862 = vmatmul.bf16.gmra.mxu3 %v601_v61  ;;  %v219_v61 = vpack.c.bf16 %v201_v57, %v200_v56 }
  0xd8   :  { %725 = vmatmul.bf16.gmra.mxu2 %v633_v60  ;;  %v309_v0 = vpop.f32.mrf.mxu0  ;;  %v171_v60 = vpack.c.bf16 %v153_v55, %v152_v54 }
  0xd9   :  { %v498_v1 = vpop.f32.mrf.mxu1  ;;  %v310_v2 = vadd.f32 %v1999_v24, %v309_v0 }
  0xda   :  { %v499_v3 = vadd.f32 %v2004_v25, %v498_v1 }
  0xdb   :  { %348 = vmatmul.bf16.gmra.mxu0 %v168_v62  ;;  %v383_v8 = vmax.f32 %v310_v2, 0.0 }
  0xdc   :  { %537 = vmatmul.bf16.gmra.mxu1 %v216_v63  ;;  %v572_v9 = vmax.f32 %v499_v3, 0.0 }
  0xe0   :  { %v311_v4 = vpop.f32.mrf.mxu0 }
  0xe1   :  { %v500_v5 = vpop.f32.mrf.mxu1  ;;  %v312_v6 = vadd.f32 %v1999_v24, %v311_v4 }
  0xe2   :  { %v501_v7 = vadd.f32 %v2004_v25, %v500_v5 }
  0xe3   :  { %v384_v10 = vmax.f32 %v312_v6, 0.0 }
  0xe4   :  { %v573_v11 = vmax.f32 %v501_v7, 0.0 }
  0xe5   :  { %v602_v17 = vpack.c.bf16 %v384_v10, %v383_v8  ;;  %v154_v10 = vld [vmem:[#allocation2 + $0xe0] sm:$0xff] }
  0xe6   :  { %v634_v16 = vpack.c.bf16 %v573_v11, %v572_v9  ;;  %v155_v11 = vld [vmem:[#allocation2 + $0xe8] sm:$0xff] }
  0xe7   :  { %867 = vmatmul.bf16.gmra.mxu3 %v602_v17  ;;  %v220_v17 = vpack.c.bf16 %v203_v13, %v202_v12 }
  0xe8   :  { %730 = vmatmul.bf16.gmra.mxu2 %v634_v16  ;;  %v314_v20 = vpop.f32.mrf.mxu0  ;;  %v172_v16 = vpack.c.bf16 %v155_v11, %v154_v10 }
  0xe9   :  { %v503_v21 = vpop.f32.mrf.mxu1  ;;  %v315_v22 = vadd.f32 %v1999_v24, %v314_v20 }
  0xea   :  { %v504_v23 = vadd.f32 %v2004_v25, %v503_v21 }
  0xeb   :  { %353 = vmatmul.bf16.gmra.mxu0 %v169_v18  ;;  %v385_v30 = vmax.f32 %v315_v22, 0.0 }
  0xec   :  { %542 = vmatmul.bf16.gmra.mxu1 %v217_v19  ;;  %v574_v31 = vmax.f32 %v504_v23, 0.0 }
  0xf0   :  { %v316_v26 = vpop.f32.mrf.mxu0 }
  0xf1   :  { %v505_v27 = vpop.f32.mrf.mxu1  ;;  %v317_v28 = vadd.f32 %v1999_v24, %v316_v26 }
  0xf2   :  { %v506_v29 = vadd.f32 %v2004_v25, %v505_v27 }
  0xf3   :  { %v386_v32 = vmax.f32 %v317_v28, 0.0 }
  0xf4   :  { %v575_v33 = vmax.f32 %v506_v29, 0.0 }
  0xf5   :  { %v603_v39 = vpack.c.bf16 %v386_v32, %v385_v30  ;;  %v156_v32 = vld [vmem:[#allocation2 + $0xf0] sm:$0xff] }
  0xf6   :  { %v635_v38 = vpack.c.bf16 %v575_v33, %v574_v31  ;;  %v157_v33 = vld [vmem:[#allocation2 + $0xf8] sm:$0xff] }
  0xf7   :  { %872 = vmatmul.bf16.gmra.mxu3 %v603_v39  ;;  %v221_v39 = vpack.c.bf16 %v205_v35, %v204_v34 }
  0xf8   :  { %735 = vmatmul.bf16.gmra.mxu2 %v635_v38  ;;  %v319_v42 = vpop.f32.mrf.mxu0  ;;  %v173_v38 = vpack.c.bf16 %v157_v33, %v156_v32 }
  0xf9   :  { %v508_v43 = vpop.f32.mrf.mxu1  ;;  %v320_v44 = vadd.f32 %v1999_v24, %v319_v42 }
  0xfa   :  { %v509_v45 = vadd.f32 %v2004_v25, %v508_v43 }
  0xfb   :  { %358 = vmatmul.bf16.gmra.mxu0 %v170_v40  ;;  %v387_v50 = vmax.f32 %v320_v44, 0.0 }
  0xfc   :  { %547 = vmatmul.bf16.gmra.mxu1 %v218_v41  ;;  %v576_v51 = vmax.f32 %v509_v45, 0.0 }
 0x100   :  { %v321_v46 = vpop.f32.mrf.mxu0 }
 0x101   :  { %v510_v47 = vpop.f32.mrf.mxu1  ;;  %v322_v48 = vadd.f32 %v1999_v24, %v321_v46 }
 0x102   :  { %v511_v49 = vadd.f32 %v2004_v25, %v510_v47 }
 0x103   :  { %v388_v52 = vmax.f32 %v322_v48, 0.0 }
 0x104   :  { %v577_v53 = vmax.f32 %v511_v49, 0.0 }
 0x105   :  { %v604_v59 = vpack.c.bf16 %v388_v52, %v387_v50 }
 0x106   :  { %v636_v58 = vpack.c.bf16 %v577_v53, %v576_v51 }
 0x107   :  { %877 = vmatmul.bf16.gmra.mxu3 %v604_v59 }
 0x108   :  { %740 = vmatmul.bf16.gmra.mxu2 %v636_v58  ;;  %v324_v62 = vpop.f32.mrf.mxu0 }
 0x109   :  { %v513_v63 = vpop.f32.mrf.mxu1  ;;  %v325_v0 = vadd.f32 %v1999_v24, %v324_v62 }
 0x10a   :  { %v514_v1 = vadd.f32 %v2004_v25, %v513_v63 }
 0x10b   :  { %363 = vmatmul.bf16.gmra.mxu0 %v171_v60  ;;  %v389_v6 = vmax.f32 %v325_v0, 0.0 }
 0x10c   :  { %552 = vmatmul.bf16.gmra.mxu1 %v219_v61  ;;  %v578_v7 = vmax.f32 %v514_v1, 0.0 }
 0x110   :  { %v326_v2 = vpop.f32.mrf.mxu0 }
 0x111   :  { %v515_v3 = vpop.f32.mrf.mxu1  ;;  %v327_v4 = vadd.f32 %v1999_v24, %v326_v2 }
 0x112   :  { %v516_v5 = vadd.f32 %v2004_v25, %v515_v3 }
 0x113   :  { %v390_v8 = vmax.f32 %v327_v4, 0.0 }
 0x114   :  { %v579_v9 = vmax.f32 %v516_v5, 0.0 }
 0x115   :  { %v605_v15 = vpack.c.bf16 %v390_v8, %v389_v6  ;;  %v2045_v6 = vld [vmem:[%s2789_s8] ss:$0 sm:$0xff] }
 0x116   :  { %v637_v14 = vpack.c.bf16 %v579_v9, %v578_v7 }
 0x117   :  { %882 = vmatmul.bf16.gmra.mxu3 %v605_v15 }
 0x118   :  { %745 = vmatmul.bf16.gmra.mxu2 %v637_v14  ;;  %v329_v18 = vpop.f32.mrf.mxu0 }
 0x119   :  { %v518_v19 = vpop.f32.mrf.mxu1  ;;  %v330_v20 = vadd.f32 %v1999_v24, %v329_v18 }
 0x11a   :  { %v519_v21 = vadd.f32 %v2004_v25, %v518_v19 }
 0x11b   :  { %368 = vmatmul.bf16.gmra.mxu0 %v172_v16  ;;  %v391_v28 = vmax.f32 %v330_v20, 0.0 }
 0x11c   :  { %557 = vmatmul.bf16.gmra.mxu1 %v220_v17  ;;  %v580_v29 = vmax.f32 %v519_v21, 0.0 }
 0x120   :  { %v331_v22 = vpop.f32.mrf.mxu0 }
 0x121   :  { %v520_v23 = vpop.f32.mrf.mxu1  ;;  %v332_v26 = vadd.f32 %v1999_v24, %v331_v22 }
 0x122   :  { %v521_v27 = vadd.f32 %v2004_v25, %v520_v23 }
 0x123   :  { %v392_v30 = vmax.f32 %v332_v26, 0.0 }
 0x124   :  { %v581_v31 = vmax.f32 %v521_v27, 0.0 }
 0x125   :  { %v606_v37 = vpack.c.bf16 %v392_v30, %v391_v28 }
 0x126   :  { %v638_v36 = vpack.c.bf16 %v581_v31, %v580_v29 }
 0x127   :  { %887 = vmatmul.bf16.gmra.mxu3 %v606_v37 }
 0x128   :  { %750 = vmatmul.bf16.gmra.mxu2 %v638_v36  ;;  %v334_v40 = vpop.f32.mrf.mxu0 }
 0x129   :  { %v523_v41 = vpop.f32.mrf.mxu1  ;;  %v335_v42 = vadd.f32 %v1999_v24, %v334_v40 }
 0x12a   :  { %v524_v43 = vadd.f32 %v2004_v25, %v523_v41 }
 0x12b   :  { %373 = vmatmul.bf16.gmra.mxu0 %v173_v38  ;;  %v393_v48 = vmax.f32 %v335_v42, 0.0 }
 0x12c   :  { %562 = vmatmul.bf16.gmra.mxu1 %v221_v39  ;;  %v582_v49 = vmax.f32 %v524_v43, 0.0 }
 0x130   :  { %v336_v44 = vpop.f32.mrf.mxu0 }
 0x131   :  { %v525_v45 = vpop.f32.mrf.mxu1  ;;  %v337_v46 = vadd.f32 %v1999_v24, %v336_v44 }
 0x132   :  { %v526_v47 = vadd.f32 %v2004_v25, %v525_v45 }
 0x133   :  { %v394_v50 = vmax.f32 %v337_v46, 0.0 }
 0x134   :  { %v583_v51 = vmax.f32 %v526_v47, 0.0 }
 0x135   :  { %v607_v53 = vpack.c.bf16 %v394_v50, %v393_v48 }
 0x136   :  { %v639_v52 = vpack.c.bf16 %v583_v51, %v582_v49 }
 0x137   :  { %892 = vmatmul.bf16.gmra.mxu3 %v607_v53 }
 0x138   :  { %755 = vmatmul.bf16.gmra.mxu2 %v639_v52  ;;  %v339_v54 = vpop.f32.mrf.mxu0 }
 0x139   :  { %v528_v55 = vpop.f32.mrf.mxu1  ;;  %v340_v56 = vadd.f32 %v1999_v24, %v339_v54 }
 0x13a   :  { %v529_v57 = vadd.f32 %v2004_v25, %v528_v55 }
 0x13b   :  { %v395_v62 = vmax.f32 %v340_v56, 0.0 }
 0x13c   :  { %v584_v63 = vmax.f32 %v529_v57, 0.0 }
 0x140   :  { %v341_v58 = vpop.f32.mrf.mxu0 }
 0x141   :  { %v530_v59 = vpop.f32.mrf.mxu1  ;;  %v342_v60 = vadd.f32 %v1999_v24, %v341_v58 }
 0x142   :  { %v531_v61 = vadd.f32 %v2004_v25, %v530_v59 }
 0x143   :  { %v396_v0 = vmax.f32 %v342_v60, 0.0 }
 0x144   :  { %v585_v1 = vmax.f32 %v531_v61, 0.0 }
 0x145   :  { %v608_v3 = vpack.c.bf16 %v396_v0, %v395_v62 }
 0x146   :  { %v640_v2 = vpack.c.bf16 %v585_v1, %v584_v63 }
 0x147   :  { %897 = vmatmul.bf16.gmra.mxu3 %v608_v3 }
 0x148   :  { %760 = vmatmul.bf16.gmra.mxu2 %v640_v2  ;;  %v344_v4 = vpop.f32.mrf.mxu0 }
 0x149   :  { %v533_v5 = vpop.f32.mrf.mxu1  ;;  %v345_v11 = vadd.f32 %v1999_v24, %v344_v4 }
 0x14a   :  { %v858_v8 = vpop.f32.mrf.mxu3  ;;  %v534_v12 = vadd.f32 %v2004_v25, %v533_v5 }
 0x14b   :  { %v721_v7 = vpop.f32.mrf.mxu2  ;;  %v397_v17 = vmax.f32 %v345_v11, 0.0 }
 0x14c   :  { %v859_v9 = vadd.f32 %v858_v8, %v721_v7  ;;  %v586_v20 = vmax.f32 %v534_v12, 0.0 }
 0x14e   :  { %v2048_v10 = vadd.f32 %v2045_v6, %v859_v9 }
 0x150   :  { %974 = vmax.xlane.f32.xlu0 %v2048_v10  ;;  %v346_v13 = vpop.f32.mrf.mxu0 }
 0x151   :  { %v535_v14 = vpop.f32.mrf.mxu1  ;;  %v347_v15 = vadd.f32 %v1999_v24, %v346_v13 }
 0x152   :  { %v536_v16 = vadd.f32 %v2004_v25, %v535_v14  ;;  %v860_v19 = vpop.f32.mrf.mxu3 }
 0x153   :  { %v723_v18 = vpop.f32.mrf.mxu2  ;;  %v398_v21 = vmax.f32 %v347_v15, 0.0 }
 0x154   :  { %v587_v22 = vmax.f32 %v536_v16, 0.0  ;;  %v861_v23 = vadd.f32 %v860_v19, %v723_v18 }
 0x155   :  { %v609_v27 = vpack.c.bf16 %v398_v21, %v397_v17 }
 0x156   :  { %v641_v26 = vpack.c.bf16 %v587_v22, %v586_v20  ;;  %v2056_v28 = vadd.f32 %v2045_v6, %v861_v23 }
 0x157   :  { %902 = vmatmul.bf16.gmra.mxu3 %v609_v27 }
 0x158   :  { %765 = vmatmul.bf16.gmra.mxu2 %v641_v26  ;;  %976 = vmax.xlane.f32.xlu0 %v2056_v28  ;;  %v349_v29 = vpop.f32.mrf.mxu0 }
 0x159   :  { %v538_v30 = vpop.f32.mrf.mxu1  ;;  %v350_v35 = vadd.f32 %v1999_v24, %v349_v29 }
 0x15a   :  { %v863_v32 = vpop.f32.mrf.mxu3  ;;  %v539_v36 = vadd.f32 %v2004_v25, %v538_v30 }
 0x15b   :  { %v726_v31 = vpop.f32.mrf.mxu2  ;;  %v399_v41 = vmax.f32 %v350_v35, 0.0 }
 0x15c   :  { %v864_v33 = vadd.f32 %v863_v32, %v726_v31  ;;  %v588_v44 = vmax.f32 %v539_v36, 0.0 }
 0x15e   :  { %v2060_v34 = vadd.f32 %v2045_v6, %v864_v33 }
 0x160   :  { %978 = vmax.xlane.f32.xlu1 %v2060_v34  ;;  %v351_v37 = vpop.f32.mrf.mxu0 }
 0x161   :  { %v540_v38 = vpop.f32.mrf.mxu1  ;;  %v352_v39 = vadd.f32 %v1999_v24, %v351_v37 }
 0x162   :  { %v541_v40 = vadd.f32 %v2004_v25, %v540_v38  ;;  %v865_v43 = vpop.f32.mrf.mxu3 }
 0x163   :  { %v728_v42 = vpop.f32.mrf.mxu2  ;;  %v400_v45 = vmax.f32 %v352_v39, 0.0 }
 0x164   :  { %v589_v46 = vmax.f32 %v541_v40, 0.0  ;;  %v866_v47 = vadd.f32 %v865_v43, %v728_v42 }
 0x165   :  { %v610_v49 = vpack.c.bf16 %v400_v45, %v399_v41 }
 0x166   :  { %v642_v48 = vpack.c.bf16 %v589_v46, %v588_v44  ;;  %v2068_v50 = vadd.f32 %v2045_v6, %v866_v47 }
 0x167   :  { %907 = vmatmul.bf16.gmra.mxu3 %v610_v49 }
 0x168   :  { %770 = vmatmul.bf16.gmra.mxu2 %v642_v48  ;;  %980 = vmax.xlane.f32.xlu1 %v2068_v50  ;;  %v354_v51 = vpop.f32.mrf.mxu0 }
 0x169   :  { %v543_v52 = vpop.f32.mrf.mxu1  ;;  %v355_v57 = vadd.f32 %v1999_v24, %v354_v51 }
 0x16a   :  { %v868_v54 = vpop.f32.mrf.mxu3  ;;  %v544_v58 = vadd.f32 %v2004_v25, %v543_v52 }
 0x16b   :  { %v731_v53 = vpop.f32.mrf.mxu2  ;;  %v401_v63 = vmax.f32 %v355_v57, 0.0 }
 0x16c   :  { %v869_v55 = vadd.f32 %v868_v54, %v731_v53  ;;  %v590_v2 = vmax.f32 %v544_v58, 0.0 }
 0x16e   :  { %v2072_v56 = vadd.f32 %v2045_v6, %v869_v55 }
 0x170   :  { %982 = vmax.xlane.f32.xlu2 %v2072_v56  ;;  %v356_v59 = vpop.f32.mrf.mxu0 }
 0x171   :  { %v545_v60 = vpop.f32.mrf.mxu1  ;;  %v357_v61 = vadd.f32 %v1999_v24, %v356_v59 }
 0x172   :  { %v546_v62 = vadd.f32 %v2004_v25, %v545_v60  ;;  %v870_v1 = vpop.f32.mrf.mxu3 }
 0x173   :  { %v733_v0 = vpop.f32.mrf.mxu2  ;;  %v402_v3 = vmax.f32 %v357_v61, 0.0 }
 0x174   :  { %v591_v4 = vmax.f32 %v546_v62, 0.0  ;;  %v871_v5 = vadd.f32 %v870_v1, %v733_v0 }
 0x175   :  { %v611_v8 = vpack.c.bf16 %v402_v3, %v401_v63 }
 0x176   :  { %v643_v7 = vpack.c.bf16 %v591_v4, %v590_v2  ;;  %v2080_v9 = vadd.f32 %v2045_v6, %v871_v5 }
 0x177   :  { %912 = vmatmul.bf16.gmra.mxu3 %v611_v8 }
 0x178   :  { %775 = vmatmul.bf16.gmra.mxu2 %v643_v7  ;;  %984 = vmax.xlane.f32.xlu2 %v2080_v9  ;;  %v359_v11 = vpop.f32.mrf.mxu0 }
 0x179   :  { %v548_v12 = vpop.f32.mrf.mxu1  ;;  %v360_v17 = vadd.f32 %v1999_v24, %v359_v11 }
 0x17a   :  { %v873_v14 = vpop.f32.mrf.mxu3  ;;  %v549_v18 = vadd.f32 %v2004_v25, %v548_v12 }
 0x17b   :  { %v736_v13 = vpop.f32.mrf.mxu2  ;;  %v403_v23 = vmax.f32 %v360_v17, 0.0 }
 0x17c   :  { %v874_v15 = vadd.f32 %v873_v14, %v736_v13  ;;  %v592_v29 = vmax.f32 %v549_v18, 0.0 }
 0x17e   :  { %v2084_v16 = vadd.f32 %v2045_v6, %v874_v15 }
 0x180   :  { %986 = vmax.xlane.f32.xlu0 %v2084_v16  ;;  %v361_v19 = vpop.f32.mrf.mxu0 }
 0x181   :  { %v550_v20 = vpop.f32.mrf.mxu1  ;;  %v362_v21 = vadd.f32 %v1999_v24, %v361_v19 }
 0x182   :  { %v551_v22 = vadd.f32 %v2004_v25, %v550_v20  ;;  %v875_v27 = vpop.f32.mrf.mxu3 }
 0x183   :  { %v738_v26 = vpop.f32.mrf.mxu2  ;;  %v404_v30 = vmax.f32 %v362_v21, 0.0 }
 0x184   :  { %v593_v31 = vmax.f32 %v551_v22, 0.0  ;;  %v876_v32 = vadd.f32 %v875_v27, %v738_v26 }
 0x185   :  { %v612_v33 = vpack.c.bf16 %v404_v30, %v403_v23 }
 0x186   :  { %v644_v35 = vpack.c.bf16 %v593_v31, %v592_v29  ;;  %v2092_v36 = vadd.f32 %v2045_v6, %v876_v32 }
 0x187   :  { %917 = vmatmul.bf16.gmra.mxu3 %v612_v33 }
 0x188   :  { %780 = vmatmul.bf16.gmra.mxu2 %v644_v35  ;;  %988 = vmax.xlane.f32.xlu1 %v2092_v36  ;;  %v364_v37 = vpop.f32.mrf.mxu0 }
 0x189   :  { %v553_v38 = vpop.f32.mrf.mxu1  ;;  %v365_v43 = vadd.f32 %v1999_v24, %v364_v37 }
 0x18a   :  { %v878_v40 = vpop.f32.mrf.mxu3  ;;  %v554_v44 = vadd.f32 %v2004_v25, %v553_v38 }
 0x18b   :  { %v741_v39 = vpop.f32.mrf.mxu2  ;;  %v405_v49 = vmax.f32 %v365_v43, 0.0 }
 0x18c   :  { %v879_v41 = vadd.f32 %v878_v40, %v741_v39  ;;  %v594_v53 = vmax.f32 %v554_v44, 0.0 }
 0x18e   :  { %v2096_v42 = vadd.f32 %v2045_v6, %v879_v41 }
 0x190   :  { %990 = vmax.xlane.f32.xlu2 %v2096_v42  ;;  %v366_v45 = vpop.f32.mrf.mxu0 }
 0x191   :  { %v555_v46 = vpop.f32.mrf.mxu1  ;;  %v367_v47 = vadd.f32 %v1999_v24, %v366_v45 }
 0x192   :  { %v556_v48 = vadd.f32 %v2004_v25, %v555_v46  ;;  %v880_v52 = vpop.f32.mrf.mxu3 }
 0x193   :  { %v743_v51 = vpop.f32.mrf.mxu2  ;;  %v406_v54 = vmax.f32 %v367_v47, 0.0 }
 0x194   :  { %v595_v55 = vmax.f32 %v556_v48, 0.0  ;;  %v881_v57 = vadd.f32 %v880_v52, %v743_v51 }
 0x195   :  { %v613_v58 = vpack.c.bf16 %v406_v54, %v405_v49  ;;  %v1038_v54 = vlaneseq }
 0x196   :  { %v645_v59 = vpack.c.bf16 %v595_v55, %v594_v53  ;;  %v2104_v60 = vadd.f32 %v2045_v6, %v881_v57 }
 0x197   :  { %922 = vmatmul.bf16.gmra.mxu3 %v613_v58  ;;  %v2135_v55 = vand.u32 127, %v1038_v54 }
 0x198   :  { %785 = vmatmul.bf16.gmra.mxu2 %v645_v59  ;;  %992 = vmax.xlane.f32.xlu0 %v2104_v60  ;;  %v369_v61 = vpop.f32.mrf.mxu0 }
 0x199   :  { %v558_v62 = vpop.f32.mrf.mxu1  ;;  %v370_v3 = vadd.f32 %v1999_v24, %v369_v61 }
 0x19a   :  { %v883_v0 = vpop.f32.mrf.mxu3  ;;  %v559_v4 = vadd.f32 %v2004_v25, %v558_v62 }
 0x19b   :  { %v746_v63 = vpop.f32.mrf.mxu2  ;;  %v407_v12 = vmax.f32 %v370_v3, 0.0 }
 0x19c   :  { %v884_v1 = vadd.f32 %v883_v0, %v746_v63  ;;  %v596_v15 = vmax.f32 %v559_v4, 0.0 }
 0x19e   :  { %v2108_v2 = vadd.f32 %v2045_v6, %v884_v1 }
 0x1a0   :  { %994 = vmax.xlane.f32.xlu1 %v2108_v2  ;;  %v371_v5 = vpop.f32.mrf.mxu0 }
 0x1a1   :  { %v560_v7 = vpop.f32.mrf.mxu1  ;;  %v372_v8 = vadd.f32 %v1999_v24, %v371_v5 }
 0x1a2   :  { %v561_v11 = vadd.f32 %v2004_v25, %v560_v7  ;;  %v885_v14 = vpop.f32.mrf.mxu3 }
 0x1a3   :  { %v748_v13 = vpop.f32.mrf.mxu2  ;;  %v408_v17 = vmax.f32 %v372_v8, 0.0 }
 0x1a4   :  { %v597_v18 = vmax.f32 %v561_v11, 0.0  ;;  %v886_v19 = vadd.f32 %v885_v14, %v748_v13 }
 0x1a5   :  { %v614_v20 = vpack.c.bf16 %v408_v17, %v407_v12 }
 0x1a6   :  { %v646_v21 = vpack.c.bf16 %v597_v18, %v596_v15  ;;  %v2116_v22 = vadd.f32 %v2045_v6, %v886_v19 }
 0x1a7   :  { %927 = vmatmul.bf16.gmra.mxu3 %v614_v20 }
 0x1a8   :  { %790 = vmatmul.bf16.gmra.mxu2 %v646_v21  ;;  %996 = vmax.xlane.f32.xlu2 %v2116_v22  ;;  %v374_v23 = vpop.f32.mrf.mxu0 }
 0x1a9   :  { %v563_v26 = vpop.f32.mrf.mxu1  ;;  %v375_v32 = vadd.f32 %v1999_v24, %v374_v23 }
 0x1aa   :  { %v888_v29 = vpop.f32.mrf.mxu3  ;;  %v564_v33 = vadd.f32 %v2004_v25, %v563_v26 }
 0x1ab   :  { %v751_v27 = vpop.f32.mrf.mxu2  ;;  %v409_v40 = vmax.f32 %v375_v32, 0.0 }
 0x1ac   :  { %v889_v30 = vadd.f32 %v888_v29, %v751_v27  ;;  %v598_v44 = vmax.f32 %v564_v33, 0.0 }
 0x1ae   :  { %v2120_v31 = vadd.f32 %v2045_v6, %v889_v30 }
 0x1b0   :  { %998 = vmax.xlane.f32.xlu0 %v2120_v31  ;;  %v376_v35 = vpop.f32.mrf.mxu0 }
 0x1b1   :  { %v565_v37 = vpop.f32.mrf.mxu1  ;;  %v377_v38 = vadd.f32 %v1999_v24, %v376_v35 }
 0x1b2   :  { %v566_v39 = vadd.f32 %v2004_v25, %v565_v37  ;;  %v890_v43 = vpop.f32.mrf.mxu3 }
 0x1b3   :  { %v753_v41 = vpop.f32.mrf.mxu2  ;;  %v410_v45 = vmax.f32 %v377_v38, 0.0 }
 0x1b4   :  { %v599_v46 = vmax.f32 %v566_v39, 0.0  ;;  %v891_v47 = vadd.f32 %v890_v43, %v753_v41 }
 0x1b5   :  { %v615_v48 = vpack.c.bf16 %v410_v45, %v409_v40 }
 0x1b6   :  { %v647_v49 = vpack.c.bf16 %v599_v46, %v598_v44  ;;  %v2128_v51 = vadd.f32 %v2045_v6, %v891_v47 }
 0x1b7   :  { %932 = vmatmul.bf16.gmra.mxu3 %v615_v48 }
 0x1b8   :  { %795 = vmatmul.bf16.gmra.mxu2 %v647_v49  ;;  %1000 = vmax.xlane.f32.xlu1 %v2128_v51 }
 0x1ba   :  { %v893_v24 = vpop.f32.mrf.mxu3 }
 0x1bb   :  { %v756_v52 = vpop.f32.mrf.mxu2 }
 0x1bc   :  { %v894_v53 = vadd.f32 %v893_v24, %v756_v52 }
 0x1be   :  { %v2132_v25 = vadd.f32 %v2045_v6, %v894_v53 }
 0x1c0   :  { %1002 = vmax.xlane.f32.xlu2 %v2132_v25 }
 0x1c2   :  { %v895_v58 = vpop.f32.mrf.mxu3 }
 0x1c3   :  { %v758_v57 = vpop.f32.mrf.mxu2  ;;  %v975_v61 = vpop.xlane.xlu0 %974 }
 0x1c4   :  { %v896_v59 = vadd.f32 %v895_v58, %v758_v57  ;;  %vm1040_vm0 = vcmp.eq.f32.partialorder %v2048_v10, %v975_v61 }
 0x1c5   :  { %v2139_v62 = vsel %vm1040_vm0, %v2135_v55, 128 }
 0x1c6   :  { %v2142_v63 = vadd.f32 %v2045_v6, %v896_v59  ;;  %v1105_v0 = vshra.s32 %v2139_v62, 16 }
 0x1c8   :  { %1004 = vmax.xlane.f32.xlu0 %v2142_v63  ;;  %v2146_v1 = vcvt.s32.f32 %v1105_v0 }
 0x1ca   :  { %1108 = vmin.xlane.f32.xlu2 %v2146_v1  ;;  %v898_v4 = vpop.f32.mrf.mxu3 }
 0x1cb   :  { %v761_v3 = vpop.f32.mrf.mxu2  ;;  %v977_v7 = vpop.xlane.xlu0 %976 }
 0x1cc   :  { %v899_v5 = vadd.f32 %v898_v4, %v761_v3  ;;  %vm1041_vm1 = vcmp.eq.f32.partialorder %v2056_v28, %v977_v7 }
 0x1cd   :  { %v2154_v8 = vsel %vm1041_vm1, %v2135_v55, 128 }
 0x1ce   :  { %v2151_v10 = vadd.f32 %v2045_v6, %v899_v5  ;;  %v1119_v11 = vshra.s32 %v2154_v8, 16 }
 0x1d0   :  { %1006 = vmax.xlane.f32.xlu1 %v2151_v10  ;;  %v2165_v18 = vcvt.s32.f32 %v1119_v11 }
 0x1d2   :  { %v900_v13 = vpop.f32.mrf.mxu3 }
 0x1d3   :  { %v763_v12 = vpop.f32.mrf.mxu2  ;;  %v979_v15 = vpop.xlane.xlu1 %978 }
 0x1d4   :  { %v901_v14 = vadd.f32 %v900_v13, %v763_v12  ;;  %vm1042_vm2 = vcmp.eq.f32.partialorder %v2060_v34, %v979_v15 }
 0x1d5   :  { %v2160_v17 = vsel %vm1042_vm2, %v2135_v55, 128 }
 0x1d6   :  { %v2163_v28 = vadd.f32 %v2045_v6, %v901_v14  ;;  %v1133_v19 = vshra.s32 %v2160_v17, 16 }
 0x1d8   :  { %1008 = vmax.xlane.f32.xlu2 %v2163_v28  ;;  %1122 = vmin.xlane.f32.xlu1 %v2165_v18  ;;  %v2170_v20 = vcvt.s32.f32 %v1133_v19 }
 0x1da   :  { %1136 = vmin.xlane.f32.xlu0 %v2170_v20  ;;  %v903_v34 = vpop.f32.mrf.mxu3 }
 0x1db   :  { %v766_v21 = vpop.f32.mrf.mxu2  ;;  %v981_v23 = vpop.xlane.xlu1 %980 }
 0x1dc   :  { %v904_v26 = vadd.f32 %v903_v34, %v766_v21  ;;  %vm1043_vm3 = vcmp.eq.f32.partialorder %v2068_v50, %v981_v23 }
 0x1dd   :  { %v2175_v27 = vsel %vm1043_vm3, %v2135_v55, 128 }
 0x1de   :  { %v1147_v29 = vshra.s32 %v2175_v27, 16  ;;  %v2179_v30 = vadd.f32 %v2045_v6, %v904_v26 }
 0x1e0   :  { %v2181_v32 = vcvt.s32.f32 %v1147_v29 }
 0x1e2   :  { %1010 = vmax.xlane.f32.xlu0 %v2179_v30  ;;  %1150 = vmin.xlane.f32.xlu2 %v2181_v32  ;;  %v905_v35 = vpop.f32.mrf.mxu3 }
 0x1e3   :  { %v768_v33 = vpop.f32.mrf.mxu2  ;;  %v983_v38 = vpop.xlane.xlu2 %982 }
 0x1e4   :  { %v906_v37 = vadd.f32 %v905_v35, %v768_v33  ;;  %vm1044_vm4 = vcmp.eq.f32.partialorder %v2072_v56, %v983_v38 }
 0x1e5   :  { %v2190_v39 = vsel %vm1044_vm4, %v2135_v55, 128 }
 0x1e6   :  { %v2187_v50 = vadd.f32 %v2045_v6, %v906_v37  ;;  %v1161_v40 = vshra.s32 %v2190_v39, 16 }
 0x1e8   :  { %1012 = vmax.xlane.f32.xlu1 %v2187_v50  ;;  %v2201_v47 = vcvt.s32.f32 %v1161_v40 }
 0x1ea   :  { %v908_v43 = vpop.f32.mrf.mxu3 }
 0x1eb   :  { %v771_v41 = vpop.f32.mrf.mxu2  ;;  %v985_v45 = vpop.xlane.xlu2 %984 }
 0x1ec   :  { %v909_v44 = vadd.f32 %v908_v43, %v771_v41  ;;  %vm1045_vm5 = vcmp.eq.f32.partialorder %v2080_v9, %v985_v45 }
 0x1ed   :  { %v2196_v46 = vsel %vm1045_vm5, %v2135_v55, 128 }
 0x1ee   :  { %v2199_v56 = vadd.f32 %v2045_v6, %v909_v44  ;;  %v1175_v48 = vshra.s32 %v2196_v46, 16 }
 0x1f0   :  { %1014 = vmax.xlane.f32.xlu2 %v2199_v56  ;;  %1164 = vmin.xlane.f32.xlu1 %v2201_v47  ;;  %v2206_v49 = vcvt.s32.f32 %v1175_v48 }
 0x1f2   :  { %1178 = vmin.xlane.f32.xlu0 %v2206_v49  ;;  %v910_v9 = vpop.f32.mrf.mxu3 }
 0x1f3   :  { %v773_v52 = vpop.f32.mrf.mxu2  ;;  %v987_v24 = vpop.xlane.xlu0 %986 }
 0x1f4   :  { %v911_v53 = vadd.f32 %v910_v9, %v773_v52  ;;  %vm1046_vm6 = vcmp.eq.f32.partialorder %v2084_v16, %v987_v24 }
 0x1f5   :  { %v2211_v54 = vsel %vm1046_vm6, %v2135_v55, 128 }
 0x1f6   :  { %v1189_v57 = vshra.s32 %v2211_v54, 16  ;;  %v2215_v58 = vadd.f32 %v2045_v6, %v911_v53 }
 0x1f8   :  { %v2217_v59 = vcvt.s32.f32 %v1189_v57 }
 0x1fa   :  { %1016 = vmax.xlane.f32.xlu0 %v2215_v58  ;;  %1192 = vmin.xlane.f32.xlu2 %v2217_v59  ;;  %v913_v0 = vpop.f32.mrf.mxu3 }
 0x1fb   :  { %v776_v61 = vpop.f32.mrf.mxu2  ;;  %v989_v4 = vpop.xlane.xlu1 %988 }
 0x1fc   :  { %v914_v3 = vadd.f32 %v913_v0, %v776_v61  ;;  %vm1047_vm7 = vcmp.eq.f32.partialorder %v2092_v36, %v989_v4 }
 0x1fd   :  { %v2226_v5 = vsel %vm1047_vm7, %v2135_v55, 128 }
 0x1fe   :  { %v2223_v16 = vadd.f32 %v2045_v6, %v914_v3  ;;  %v1203_v7 = vshra.s32 %v2226_v5, 16 }
 0x200   :  { %1018 = vmax.xlane.f32.xlu1 %v2223_v16  ;;  %v2234_v36 = vcvt.s32.f32 %v1203_v7 }
 0x202   :  { %v915_v12 = vpop.f32.mrf.mxu3 }
 0x203   :  { %v778_v11 = vpop.f32.mrf.mxu2  ;;  %v991_v14 = vpop.xlane.xlu2 %990 }
 0x204   :  { %v916_v13 = vadd.f32 %v915_v12, %v778_v11  ;;  %vm1048_vm8 = vcmp.eq.f32.partialorder %v2096_v42, %v991_v14 }
 0x205   :  { %v2232_v15 = vsel %vm1048_vm8, %v2135_v55, 128 }
 0x206   :  { %v2237_v19 = vadd.f32 %v2045_v6, %v916_v13  ;;  %v1217_v21 = vshra.s32 %v2232_v15, 16 }
 0x208   :  { %1206 = vmin.xlane.f32.xlu1 %v2234_v36  ;;  %1020 = vmax.xlane.f32.xlu2 %v2237_v19  ;;  %v2242_v34 = vcvt.s32.f32 %v1217_v21 }
 0x20a   :  { %1220 = vmin.xlane.f32.xlu0 %v2242_v34  ;;  %v918_v42 = vpop.f32.mrf.mxu3 }
 0x20b   :  { %v781_v23 = vpop.f32.mrf.mxu2  ;;  %v993_v26 = vpop.xlane.xlu0 %992 }
 0x20c   :  { %v919_v29 = vadd.f32 %v918_v42, %v781_v23  ;;  %vm1049_vm9 = vcmp.eq.f32.partialorder %v2104_v60, %v993_v26 }
 0x20d   :  { %v2247_v33 = vsel %vm1049_vm9, %v2135_v55, 128 }
 0x20e   :  { %v1231_v35 = vshra.s32 %v2247_v33, 16  ;;  %v2251_v37 = vadd.f32 %v2045_v6, %v919_v29 }
 0x210   :  { %v2253_v38 = vcvt.s32.f32 %v1231_v35 }
 0x212   :  { %1022 = vmax.xlane.f32.xlu0 %v2251_v37  ;;  %1234 = vmin.xlane.f32.xlu2 %v2253_v38  ;;  %v920_v41 = vpop.f32.mrf.mxu3 }
 0x213   :  { %v783_v40 = vpop.f32.mrf.mxu2  ;;  %v995_v44 = vpop.xlane.xlu1 %994 }
 0x214   :  { %v921_v43 = vadd.f32 %v920_v41, %v783_v40  ;;  %vm1050_vm10 = vcmp.eq.f32.partialorder %v2108_v2, %v995_v44 }
 0x215   :  { %v2262_v45 = vsel %vm1050_vm10, %v2135_v55, 128 }
 0x216   :  { %v2259_v60 = vadd.f32 %v2045_v6, %v921_v43  ;;  %v1245_v48 = vshra.s32 %v2262_v45, 16 }
 0x218   :  { %1024 = vmax.xlane.f32.xlu1 %v2259_v60  ;;  %v2270_v2 = vcvt.s32.f32 %v1245_v48 }
 0x21a   :  { %v923_v9 = vpop.f32.mrf.mxu3 }
 0x21b   :  { %v786_v52 = vpop.f32.mrf.mxu2  ;;  %v997_v53 = vpop.xlane.xlu2 %996 }
 0x21c   :  { %v924_v24 = vadd.f32 %v923_v9, %v786_v52  ;;  %vm1051_vm11 = vcmp.eq.f32.partialorder %v2116_v22, %v997_v53 }
 0x21d   :  { %v2268_v57 = vsel %vm1051_vm11, %v2135_v55, 128 }
 0x21e   :  { %v2273_v61 = vadd.f32 %v2045_v6, %v924_v24  ;;  %v1259_v0 = vshra.s32 %v2268_v57, 16 }
 0x220   :  { %1248 = vmin.xlane.f32.xlu1 %v2270_v2  ;;  %1026 = vmax.xlane.f32.xlu2 %v2273_v61  ;;  %v2278_v3 = vcvt.s32.f32 %v1259_v0 }
 0x222   :  { %1262 = vmin.xlane.f32.xlu0 %v2278_v3  ;;  %v925_v22 = vpop.f32.mrf.mxu3 }
 0x223   :  { %v788_v4 = vpop.f32.mrf.mxu2  ;;  %v999_v7 = vpop.xlane.xlu0 %998 }
 0x224   :  { %v926_v11 = vadd.f32 %v925_v22, %v788_v4  ;;  %vm1052_vm12 = vcmp.eq.f32.partialorder %v2120_v31, %v999_v7 }
 0x225   :  { %v2283_v12 = vsel %vm1052_vm12, %v2135_v55, 128 }
 0x226   :  { %v1273_v13 = vshra.s32 %v2283_v12, 16  ;;  %v2287_v14 = vadd.f32 %v2045_v6, %v926_v11 }
 0x228   :  { %v2289_v21 = vcvt.s32.f32 %v1273_v13 }
 0x22a   :  { %1028 = vmax.xlane.f32.xlu0 %v2287_v14  ;;  %1276 = vmin.xlane.f32.xlu2 %v2289_v21  ;;  %v928_v42 = vpop.f32.mrf.mxu3 }
 0x22b   :  { %v791_v23 = vpop.f32.mrf.mxu2  ;;  %v1001_v29 = vpop.xlane.xlu1 %1000 }
 0x22c   :  { %v929_v26 = vadd.f32 %v928_v42, %v791_v23  ;;  %vm1053_vm13 = vcmp.eq.f32.partialorder %v2128_v51, %v1001_v29 }
 0x22d   :  { %v2298_v35 = vsel %vm1053_vm13, %v2135_v55, 128 }
 0x22e   :  { %v2295_v31 = vadd.f32 %v2045_v6, %v929_v26  ;;  %v1287_v40 = vshra.s32 %v2298_v35, 16 }
 0x230   :  { %1030 = vmax.xlane.f32.xlu1 %v2295_v31  ;;  %v2306_v51 = vcvt.s32.f32 %v1287_v40 }
 0x232   :  { %v930_v43 = vpop.f32.mrf.mxu3 }
 0x233   :  { %v793_v41 = vpop.f32.mrf.mxu2  ;;  %v1003_v48 = vpop.xlane.xlu2 %1002 }
 0x234   :  { %v931_v44 = vadd.f32 %v930_v43, %v793_v41  ;;  %vm1054_vm14 = vcmp.eq.f32.partialorder %v2132_v25, %v1003_v48  ;;  %v1118_v48 = vand.u32 65535, %v2154_v8 }
 0x235   :  { %v2304_v52 = vsel %vm1054_vm14, %v2135_v55, 128 }
 0x236   :  { %v2309_v9 = vadd.f32 %v2045_v6, %v931_v44  ;;  %v1301_v24 = vshra.s32 %v2304_v52, 16 }
 0x238   :  { %1290 = vmin.xlane.f32.xlu1 %v2306_v51  ;;  %1032 = vmax.xlane.f32.xlu2 %v2309_v9  ;;  %v2314_v53 = vcvt.s32.f32 %v1301_v24 }
 0x23a   :  { %1304 = vmin.xlane.f32.xlu0 %v2314_v53  ;;  %v933_v25 = vpop.f32.mrf.mxu3 }
 0x23b   :  { %v796_v0 = vpop.f32.mrf.mxu2  ;;  %v1005_v4 = vpop.xlane.xlu0 %1004 }
 0x23c   :  { %v934_v22 = vadd.f32 %v933_v25, %v796_v0  ;;  %vm1055_vm15 = vcmp.eq.f32.partialorder %v2142_v63, %v1005_v4  ;;  %v1104_v63 = vand.u32 65535, %v2139_v62 }
 0x23d   :  { %v2319_v7 = vsel %vm1055_vm15, %v2135_v55, 128  ;;  %v2327_v42 = vpop.xlane.xlu2 %1108 }
 0x23e   :  { %v1315_v11 = vshra.s32 %v2319_v7, 16  ;;  %v2323_v13 = vadd.f32 %v2045_v6, %v934_v22  ;;  %vm1110_vm1 = vcmp.eq.f32.partialorder %v2146_v1, %v2327_v42  ;;  %v1106_v24 = vcvt.s32.f32 %v1104_v63 }
 0x240   :  { %v2325_v23 = vcvt.s32.f32 %v1315_v11  ;;  %v1111_v0 = vsel %vm1110_vm1, %v1106_v24, inf }
 0x242   :  { %1034 = vmax.xlane.f32.xlu0 %v2323_v13  ;;  %1318 = vmin.xlane.f32.xlu2 %v2325_v23  ;;  %v935_v29 = vpop.f32.mrf.mxu3 }
 0x243   :  { %v798_v26 = vpop.f32.mrf.mxu2  ;;  %v1007_v41 = vpop.xlane.xlu1 %1006 }
 0x244   :  { %v936_v40 = vadd.f32 %v935_v29, %v798_v26  ;;  %vm1056_vm0 = vcmp.eq.f32.partialorder %v2151_v10, %v1007_v41  ;;  %v1120_v10 = vcvt.s32.f32 %v1118_v48  ;;  %v1132_v26 = vand.u32 65535, %v2160_v17 }
 0x245   :  { %v2337_v44 = vsel %vm1056_vm0, %v2135_v55, 128  ;;  %v1146_v29 = vand.u32 65535, %v2175_v27 }
 0x246   :  { %v2334_v43 = vadd.f32 %v2045_v6, %v936_v40  ;;  %v1329_v62 = vshra.s32 %v2337_v44, 16 }
 0x247   :  { %v1148_v17 = vcvt.s32.f32 %v1146_v29 }
 0x248   :  { %1036 = vmax.xlane.f32.xlu1 %v2334_v43  ;;  %v2354_v22 = vcvt.s32.f32 %v1329_v62  ;;  %v1160_v62 = vand.u32 65535, %v2190_v39 }
 0x24a   :  { %1112 = vmin.xlane.f32.xlu0 %v1111_v0 }
 0x24b   :  { %v1009_v25 = vpop.xlane.xlu2 %1008  ;;  %v2345_v6 = vpop.xlane.xlu1 %1122 }
 0x24c   :  { %vm1057_vm2 = vcmp.eq.f32.partialorder %v2163_v28, %v1009_v25  ;;  %vm1124_vm3 = vcmp.eq.f32.partialorder %v2165_v18, %v2345_v6  ;;  %v1134_v18 = vcvt.s32.f32 %v1132_v26  ;;  %v1162_v26 = vcvt.s32.f32 %v1160_v62 }
 0x24d   :  { %v2348_v4 = vsel %vm1057_vm2, %v2135_v55, 128  ;;  %v2352_v1 = vpop.xlane.xlu0 %1136  ;;  %v1125_v8 = vsel %vm1124_vm3, %v1120_v10, inf  ;;  %v1174_v10 = vand.u32 65535, %v2196_v46  ;;  %v1202_v62 = vand.u32 65535, %v2226_v5 }
 0x24e   :  { %v1343_v11 = vshra.s32 %v2348_v4, 16  ;;  %1126 = vmin.xlane.f32.xlu2 %v1125_v8  ;;  %vm1138_vm4 = vcmp.eq.f32.partialorder %v2170_v20, %v2352_v1 }
 0x24f   :  { %v1139_v41 = vsel %vm1138_vm4, %v1134_v18, inf  ;;  %v1176_v39 = vcvt.s32.f32 %v1174_v10 }
 0x250   :  { %1332 = vmin.xlane.f32.xlu1 %v2354_v22  ;;  %v2358_v28 = vcvt.s32.f32 %v1343_v11 }
 0x252   :  { %1346 = vmin.xlane.f32.xlu0 %v2358_v28 }
 0x255   :  { %v2365_v63 = vpop.xlane.xlu2 %1150  ;;  %v1011_v40 = vpop.xlane.xlu0 %1010 }
 0x256   :  { %vm1058_vm5 = vcmp.eq.f32.partialorder %v2179_v30, %v1011_v40  ;;  %vm1152_vm6 = vcmp.eq.f32.partialorder %v2181_v32, %v2365_v63  ;;  %v1188_v40 = vand.u32 65535, %v2211_v54 }
 0x257   :  { %v2371_v48 = vsel %vm1058_vm5, %v2135_v55, 128  ;;  %v1153_v24 = vsel %vm1152_vm6, %v1148_v17, inf }
 0x258   :  { %1140 = vmin.xlane.f32.xlu1 %v1139_v41  ;;  %v1357_v27 = vshra.s32 %v2371_v48, 16  ;;  %v1190_v17 = vcvt.s32.f32 %v1188_v40 }
 0x25a   :  { %1154 = vmin.xlane.f32.xlu0 %v1153_v24  ;;  %v2374_v0 = vcvt.s32.f32 %v1357_v27 }
 0x25b   :  { %v1013_v20 = vpop.xlane.xlu1 %1012 }
 0x25c   :  { %vm1059_vm7 = vcmp.eq.f32.partialorder %v2187_v50, %v1013_v20  ;;  %1360 = vmin.xlane.f32.xlu2 %v2374_v0 }
 0x25d   :  { %v2378_v30 = vsel %vm1059_vm7, %v2135_v55, 128 }
 0x25e   :  { %v1371_v32 = vshra.s32 %v2378_v30, 16 }
 0x260   :  { %v2383_v25 = vcvt.s32.f32 %v1371_v32 }
 0x262   :  { %1374 = vmin.xlane.f32.xlu0 %v2383_v25 }
 0x263   :  { %v1015_v8 = vpop.xlane.xlu2 %1014  ;;  %v2387_v11 = vpop.xlane.xlu1 %1164 }
 0x264   :  { %vm1166_vm8 = vcmp.eq.f32.partialorder %v2201_v47, %v2387_v11  ;;  %vm1060_vm9 = vcmp.eq.f32.partialorder %v2199_v56, %v1015_v8  ;;  %v1216_v8 = vand.u32 65535, %v2232_v15 }
 0x265   :  { %v1167_v50 = vsel %vm1166_vm8, %v1162_v26, inf  ;;  %v2392_v29 = vpop.xlane.xlu0 %1178  ;;  %v2397_v46 = vsel %vm1060_vm9, %v2135_v55, 128 }
 0x266   :  { %1168 = vmin.xlane.f32.xlu2 %v1167_v50  ;;  %vm1180_vm10 = vcmp.eq.f32.partialorder %v2206_v49, %v2392_v29  ;;  %v1385_v41 = vshra.s32 %v2397_v46, 16  ;;  %v1218_v5 = vcvt.s32.f32 %v1216_v8 }
 0x267   :  { %v1181_v18 = vsel %vm1180_vm10, %v1176_v39, inf  ;;  %v1204_v39 = vcvt.s32.f32 %v1202_v62  ;;  %v1244_v62 = vand.u32 65535, %v2262_v45 }
 0x268   :  { %1182 = vmin.xlane.f32.xlu1 %v1181_v18  ;;  %v2406_v27 = vcvt.s32.f32 %v1385_v41  ;;  %v1230_v41 = vand.u32 65535, %v2247_v33 }
 0x26d   :  { %v2401_v47 = vpop.xlane.xlu2 %1192  ;;  %v1017_v56 = vpop.xlane.xlu0 %1016 }
 0x26e   :  { %vm1061_vm11 = vcmp.eq.f32.partialorder %v2215_v58, %v1017_v56  ;;  %vm1194_vm12 = vcmp.eq.f32.partialorder %v2217_v59, %v2401_v47 }
 0x26f   :  { %v2409_v49 = vsel %vm1061_vm11, %v2135_v55, 128  ;;  %v1195_v24 = vsel %vm1194_vm12, %v1190_v17, inf  ;;  %v1232_v17 = vcvt.s32.f32 %v1230_v41 }
 0x270   :  { %1196 = vmin.xlane.f32.xlu0 %v1195_v24  ;;  %1388 = vmin.xlane.f32.xlu1 %v2406_v27  ;;  %v1399_v54 = vshra.s32 %v2409_v49, 16 }
 0x272   :  { %v2413_v32 = vcvt.s32.f32 %v1399_v54 }
 0x273   :  { %v1019_v20 = vpop.xlane.xlu1 %1018 }
 0x274   :  { %vm1062_vm13 = vcmp.eq.f32.partialorder %v2223_v16, %v1019_v20  ;;  %1402 = vmin.xlane.f32.xlu2 %v2413_v32 }
 0x275   :  { %v2417_v58 = vsel %vm1062_vm13, %v2135_v55, 128 }
 0x276   :  { %v1413_v59 = vshra.s32 %v2417_v58, 16 }
 0x278   :  { %v2422_v10 = vcvt.s32.f32 %v1413_v59 }
 0x27a   :  { %1416 = vmin.xlane.f32.xlu0 %v2422_v10 }
 0x27b   :  { %v2426_v26 = vpop.xlane.xlu1 %1206  ;;  %v1021_v50 = vpop.xlane.xlu2 %1020 }
 0x27c   :  { %vm1208_vm14 = vcmp.eq.f32.partialorder %v2234_v36, %v2426_v26  ;;  %vm1063_vm15 = vcmp.eq.f32.partialorder %v2237_v19, %v1021_v50  ;;  %v1258_v50 = vand.u32 65535, %v2268_v57 }
 0x27d   :  { %v1209_v16 = vsel %vm1208_vm14, %v1204_v39, inf  ;;  %v2431_v18 = vpop.xlane.xlu0 %1220  ;;  %v2436_v15 = vsel %vm1063_vm15, %v2135_v55, 128 }
 0x27e   :  { %1210 = vmin.xlane.f32.xlu2 %v1209_v16  ;;  %vm1222_vm0 = vcmp.eq.f32.partialorder %v2242_v34, %v2431_v18  ;;  %v1427_v56 = vshra.s32 %v2436_v15, 16  ;;  %v1260_v45 = vcvt.s32.f32 %v1258_v50 }
 0x27f   :  { %v1223_v40 = vsel %vm1222_vm0, %v1218_v5, inf  ;;  %v1246_v5 = vcvt.s32.f32 %v1244_v62  ;;  %v1286_v62 = vand.u32 65535, %v2298_v35  ;;  %vm1552_vm0 = vcmask 7168  }
 0x280   :  { %1224 = vmin.xlane.f32.xlu1 %v1223_v40  ;;  %v2445_v24 = vcvt.s32.f32 %v1427_v56  ;;  %v1272_v56 = vand.u32 65535, %v2283_v12 }
 0x285   :  { %v2440_v36 = vpop.xlane.xlu2 %1234  ;;  %v1023_v19 = vpop.xlane.xlu0 %1022 }
 0x286   :  { %vm1064_vm1 = vcmp.eq.f32.partialorder %v2251_v37, %v1023_v19  ;;  %vm1236_vm2 = vcmp.eq.f32.partialorder %v2253_v38, %v2440_v36 }
 0x287   :  { %v2448_v34 = vsel %vm1064_vm1, %v2135_v55, 128  ;;  %v1237_v54 = vsel %vm1236_vm2, %v1232_v17, inf  ;;  %v1274_v17 = vcvt.s32.f32 %v1272_v56 }
 0x288   :  { %1238 = vmin.xlane.f32.xlu0 %v1237_v54  ;;  %1430 = vmin.xlane.f32.xlu1 %v2445_v24  ;;  %v1441_v33 = vshra.s32 %v2448_v34, 16 }
 0x28a   :  { %v2452_v59 = vcvt.s32.f32 %v1441_v33 }
 0x28b   :  { %v1025_v20 = vpop.xlane.xlu1 %1024 }
 0x28c   :  { %vm1065_vm3 = vcmp.eq.f32.partialorder %v2259_v60, %v1025_v20  ;;  %1444 = vmin.xlane.f32.xlu2 %v2452_v59 }
 0x28d   :  { %v2456_v37 = vsel %vm1065_vm3, %v2135_v55, 128 }
 0x28e   :  { %v1455_v38 = vshra.s32 %v2456_v37, 16 }
 0x290   :  { %v2461_v8 = vcvt.s32.f32 %v1455_v38 }
 0x292   :  { %1458 = vmin.xlane.f32.xlu0 %v2461_v8 }
 0x293   :  { %v2465_v39 = vpop.xlane.xlu1 %1248  ;;  %v1027_v16 = vpop.xlane.xlu2 %1026 }
 0x294   :  { %vm1250_vm4 = vcmp.eq.f32.partialorder %v2270_v2, %v2465_v39  ;;  %vm1066_vm5 = vcmp.eq.f32.partialorder %v2273_v61, %v1027_v16  ;;  %v1300_v16 = vand.u32 65535, %v2304_v52 }
 0x295   :  { %v1251_v60 = vsel %vm1250_vm4, %v1246_v5, inf  ;;  %v2470_v40 = vpop.xlane.xlu0 %1262  ;;  %v2475_v57 = vsel %vm1066_vm5, %v2135_v55, 128 }
 0x296   :  { %1252 = vmin.xlane.f32.xlu2 %v1251_v60  ;;  %vm1264_vm6 = vcmp.eq.f32.partialorder %v2278_v3, %v2470_v40  ;;  %v1469_v19 = vshra.s32 %v2475_v57, 16  ;;  %v1302_v35 = vcvt.s32.f32 %v1300_v16 }
 0x297   :  { %v1265_v41 = vsel %vm1264_vm6, %v1260_v45, inf  ;;  %v1288_v45 = vcvt.s32.f32 %v1286_v62 }
 0x298   :  { %1266 = vmin.xlane.f32.xlu1 %v1265_v41  ;;  %v2484_v54 = vcvt.s32.f32 %v1469_v19  ;;  %v1314_v19 = vand.u32 65535, %v2319_v7 }
 0x29d   :  { %v2479_v2 = vpop.xlane.xlu2 %1276  ;;  %v1029_v61 = vpop.xlane.xlu0 %1028 }
 0x29e   :  { %vm1067_vm7 = vcmp.eq.f32.partialorder %v2287_v14, %v1029_v61  ;;  %vm1278_vm8 = vcmp.eq.f32.partialorder %v2289_v21, %v2479_v2 }
 0x29f   :  { %v2487_v3 = vsel %vm1067_vm7, %v2135_v55, 128  ;;  %v1279_v33 = vsel %vm1278_vm8, %v1274_v17, inf  ;;  %v1316_v17 = vcvt.s32.f32 %v1314_v19 }
 0x2a0   :  { %1280 = vmin.xlane.f32.xlu0 %v1279_v33  ;;  %1472 = vmin.xlane.f32.xlu1 %v2484_v54  ;;  %v1483_v12 = vshra.s32 %v2487_v3, 16 }
 0x2a2   :  { %v2491_v38 = vcvt.s32.f32 %v1483_v12 }
 0x2a3   :  { %v1031_v20 = vpop.xlane.xlu1 %1030 }
 0x2a4   :  { %vm1068_vm9 = vcmp.eq.f32.partialorder %v2295_v31, %v1031_v20  ;;  %1486 = vmin.xlane.f32.xlu2 %v2491_v38  ;;  %v1115_v20 = vcvt.f32.s32 %v2327_v42 }
 0x2a5   :  { %v2495_v14 = vsel %vm1068_vm9, %v2135_v55, 128 }
 0x2a6   :  { %v1497_v21 = vshra.s32 %v2495_v14, 16 }
 0x2a8   :  { %v2500_v50 = vcvt.s32.f32 %v1497_v21 }
 0x2aa   :  { %1500 = vmin.xlane.f32.xlu0 %v2500_v50 }
 0x2ab   :  { %v2504_v5 = vpop.xlane.xlu1 %1290  ;;  %v1033_v60 = vpop.xlane.xlu2 %1032 }
 0x2ac   :  { %vm1292_vm10 = vcmp.eq.f32.partialorder %v2306_v51, %v2504_v5  ;;  %vm1069_vm11 = vcmp.eq.f32.partialorder %v2309_v9, %v1033_v60  ;;  %v1116_v60 = vshll.u32 %v1115_v20, 16 }
 0x2ad   :  { %v1293_v31 = vsel %vm1292_vm10, %v1288_v45, inf  ;;  %v2509_v41 = vpop.xlane.xlu0 %1304  ;;  %v2514_v52 = vsel %vm1069_vm11, %v2135_v55, 128  ;;  %v1328_v45 = vand.u32 65535, %v2337_v44 }
 0x2ae   :  { %1294 = vmin.xlane.f32.xlu2 %v1293_v31  ;;  %vm1306_vm12 = vcmp.eq.f32.partialorder %v2314_v53, %v2509_v41  ;;  %v1511_v61 = vshra.s32 %v2514_v52, 16  ;;  %v1129_v31 = vcvt.f32.s32 %v2345_v6 }
 0x2af   :  { %v1307_v56 = vsel %vm1306_vm12, %v1302_v35, inf  ;;  %v1330_v6 = vcvt.s32.f32 %v1328_v45 }
 0x2b0   :  { %1308 = vmin.xlane.f32.xlu1 %v1307_v56  ;;  %v2523_v33 = vcvt.s32.f32 %v1511_v61 }
 0x2b5   :  { %v2518_v51 = vpop.xlane.xlu2 %1318  ;;  %v1035_v9 = vpop.xlane.xlu0 %1034 }
 0x2b6   :  { %vm1070_vm13 = vcmp.eq.f32.partialorder %v2323_v13, %v1035_v9  ;;  %vm1320_vm14 = vcmp.eq.f32.partialorder %v2325_v23, %v2518_v51 }
 0x2b7   :  { %v2526_v53 = vsel %vm1070_vm13, %v2135_v55, 128  ;;  %v1321_v12 = vsel %vm1320_vm14, %v1316_v17, inf }
 0x2b8   :  { %1322 = vmin.xlane.f32.xlu0 %v1321_v12  ;;  %1514 = vmin.xlane.f32.xlu1 %v2523_v33  ;;  %v1525_v7 = vshra.s32 %v2526_v53, 16 }
 0x2ba   :  { %v2531_v62 = vcvt.s32.f32 %v1525_v7  ;;  %v1143_v7 = vcvt.f32.s32 %v2352_v1 }
 0x2bb   :  { %v1037_v21 = vpop.xlane.xlu1 %1036 }
 0x2bc   :  { %vm1071_vm15 = vcmp.eq.f32.partialorder %v2334_v43, %v1037_v21  ;;  %1528 = vmin.xlane.f32.xlu2 %v2531_v62  ;;  %v1342_v43 = vand.u32 65535, %v2348_v4 }
 0x2bd   :  { %v2535_v13 = vsel %vm1071_vm15, %v2135_v55, 128  ;;  %v1113_v23 = vpop.xlane.xlu0 %1112  ;;  %v1130_v55 = vshll.u32 %v1129_v31, 16 }
 0x2be   :  { %v1539_v16 = vshra.s32 %v2535_v13, 16  ;;  %v1114_v35 = vcvt.f32.s32 %v1113_v23  ;;  %v1344_v4 = vcvt.s32.f32 %v1342_v43  ;;  %v1144_v23 = vshll.u32 %v1143_v7, 16 }
 0x2c0   :  { %v2541_v42 = vcvt.s32.f32 %v1539_v16  ;;  %v1117_v56 = vadd.s32 %v1116_v60, %v1114_v35  ;;  %v1356_v16 = vand.u32 65535, %v2371_v48 }
 0x2c1   :  { %v1127_v19 = vpop.xlane.xlu2 %1126 }
 0x2c2   :  { %1542 = vmin.xlane.f32.xlu0 %v2541_v42  ;;  %1553 = vst.msk [vmem:[%s2790_s9] sm:$0xff] %vm1552_vm0, %v1117_v56  ;;  %v1128_v61 = vcvt.f32.s32 %v1127_v19  ;;  %v1358_v1 = vcvt.s32.f32 %v1356_v16  ;;  %v1171_v19 = vcvt.f32.s32 %v2387_v11 }
 0x2c3   :  { %v2549_v44 = vpop.xlane.xlu1 %1332 }
 0x2c4   :  { %vm1334_vm1 = vcmp.eq.f32.partialorder %v2354_v22, %v2549_v44  ;;  %v1131_v9 = vadd.s32 %v1130_v55, %v1128_v61  ;;  %v1157_v22 = vcvt.f32.s32 %v2365_v63  ;;  %v1370_v63 = vand.u32 65535, %v2378_v30 }
 0x2c5   :  { %v1335_v17 = vsel %vm1334_vm1, %v1330_v6, inf  ;;  %v2553_v12 = vpop.xlane.xlu0 %1346 }
 0x2c6   :  { %1336 = vmin.xlane.f32.xlu2 %v1335_v17  ;;  %1554 = vst.msk [vmem:[%s2790_s9 + $0x8] sm:$0xff] %vm1552_vm0, %v1131_v9  ;;  %vm1348_vm2 = vcmp.eq.f32.partialorder %v2358_v28, %v2553_v12  ;;  %v1158_v35 = vshll.u32 %v1157_v22, 16  ;;  %v1372_v61 = vcvt.s32.f32 %v1370_v63  ;;  %v1172_v9 = vshll.u32 %v1171_v19, 16 }
 0x2c7   :  { %v1349_v20 = vsel %vm1348_vm2, %v1344_v4, inf  ;;  %v1213_v63 = vcvt.f32.s32 %v2426_v26 }
 0x2c8   :  { %1350 = vmin.xlane.f32.xlu1 %v1349_v20 }
 0x2cb   :  { %v1141_v21 = vpop.xlane.xlu1 %1140 }
 0x2cc   :  { %v1142_v60 = vcvt.f32.s32 %v1141_v21  ;;  %v1384_v21 = vand.u32 65535, %v2397_v46 }
 0x2cd   :  { %v1155_v31 = vpop.xlane.xlu0 %1154 }
 0x2ce   :  { %v1145_v45 = vadd.s32 %v1144_v23, %v1142_v60  ;;  %v1156_v56 = vcvt.f32.s32 %v1155_v31  ;;  %v1386_v60 = vcvt.s32.f32 %v1384_v21 }
 0x2cf   :  { %v2568_v28 = vpop.xlane.xlu2 %1360 }
 0x2d0   :  { %1555 = vst.msk [vmem:[%s2790_s9 + $0x10] sm:$0xff] %vm1552_vm0, %v1145_v45  ;;  %v1159_v43 = vadd.s32 %v1158_v35, %v1156_v56  ;;  %vm1362_vm3 = vcmp.eq.f32.partialorder %v2374_v0, %v2568_v28  ;;  %v1185_v0 = vcvt.f32.s32 %v2392_v29  ;;  %v1398_v29 = vand.u32 65535, %v2409_v49 }
 0x2d1   :  { %v1363_v48 = vsel %vm1362_vm3, %v1358_v1, inf  ;;  %v1412_v1 = vand.u32 65535, %v2417_v58  ;;  %v1227_v58 = vcvt.f32.s32 %v2431_v18  ;;  %v1440_v18 = vand.u32 65535, %v2448_v34 }
 0x2d2   :  { %1556 = vst.msk [vmem:[%s2790_s9 + $0x18] sm:$0xff] %vm1552_vm0, %v1159_v43  ;;  %1364 = vmin.xlane.f32.xlu1 %v1363_v48  ;;  %v1186_v20 = vshll.u32 %v1185_v0, 16  ;;  %v1400_v56 = vcvt.s32.f32 %v1398_v29  ;;  %v1454_v29 = vand.u32 65535, %v2456_v37  ;;  %v1269_v37 = vcvt.f32.s32 %v2470_v40 }
 0x2d3   :  { %v1482_v40 = vand.u32 65535, %v2487_v3 }
 0x2d5   :  { %v2578_v55 = vpop.xlane.xlu0 %1374 }
 0x2d6   :  { %vm1376_vm4 = vcmp.eq.f32.partialorder %v2383_v25, %v2578_v55  ;;  %v1199_v25 = vcvt.f32.s32 %v2401_v47 }
 0x2d7   :  { %v1377_v6 = vsel %vm1376_vm4, %v1372_v61, inf  ;;  %v1214_v61 = vshll.u32 %v1213_v63, 16 }
 0x2d8   :  { %1378 = vmin.xlane.f32.xlu2 %v1377_v6  ;;  %v1200_v45 = vshll.u32 %v1199_v25, 16  ;;  %v1442_v25 = vcvt.s32.f32 %v1440_v18 }
 0x2d9   :  { %v1169_v30 = vpop.xlane.xlu2 %1168 }
 0x2da   :  { %v1170_v17 = vcvt.f32.s32 %v1169_v30 }
 0x2db   :  { %v1183_v7 = vpop.xlane.xlu1 %1182 }
 0x2dc   :  { %v1173_v4 = vadd.s32 %v1172_v9, %v1170_v17  ;;  %v1184_v22 = vcvt.f32.s32 %v1183_v7  ;;  %v1426_v17 = vand.u32 65535, %v2436_v15 }
 0x2de   :  { %1557 = vst.msk [vmem:[%s2790_s9 + $0x20] sm:$0xff] %vm1552_vm0, %v1173_v4  ;;  %v1187_v11 = vadd.s32 %v1186_v20, %v1184_v22  ;;  %v1428_v20 = vcvt.s32.f32 %v1426_v17 }
 0x2e0   :  { %1558 = vst.msk [vmem:[%s2790_s9 + $0x28] sm:$0xff] %vm1552_vm0, %v1187_v11 }
 0x2e3   :  { %v2594_v23 = vpop.xlane.xlu1 %1388  ;;  %v1197_v16 = vpop.xlane.xlu0 %1196 }
 0x2e4   :  { %v1198_v31 = vcvt.f32.s32 %v1197_v16  ;;  %vm1390_vm5 = vcmp.eq.f32.partialorder %v2406_v27, %v2594_v23  ;;  %v1414_v27 = vcvt.s32.f32 %v1412_v1 }
 0x2e5   :  { %v1391_v35 = vsel %vm1390_vm5, %v1386_v60, inf  ;;  %v1255_v60 = vcvt.f32.s32 %v2465_v39 }
 0x2e6   :  { %v1201_v46 = vadd.s32 %v1200_v45, %v1198_v31  ;;  %1392 = vmin.xlane.f32.xlu0 %v1391_v35 }
 0x2e7   :  { %v2598_v47 = vpop.xlane.xlu2 %1402  ;;  %v1256_v35 = vshll.u32 %v1255_v60, 16 }
 0x2e8   :  { %1559 = vst.msk [vmem:[%s2790_s9 + $0x30] sm:$0xff] %vm1552_vm0, %v1201_v46  ;;  %vm1404_vm6 = vcmp.eq.f32.partialorder %v2413_v32, %v2598_v47  ;;  %v1228_v32 = vshll.u32 %v1227_v58, 16 }
 0x2e9   :  { %v1405_v49 = vsel %vm1404_vm6, %v1400_v56, inf }
 0x2ea   :  { %1406 = vmin.xlane.f32.xlu1 %v1405_v49 }
 0x2ed   :  { %v2607_v43 = vpop.xlane.xlu0 %1416 }
 0x2ee   :  { %vm1418_vm7 = vcmp.eq.f32.partialorder %v2422_v10, %v2607_v43  ;;  %v1241_v10 = vcvt.f32.s32 %v2440_v36 }
 0x2ef   :  { %v1419_v48 = vsel %vm1418_vm7, %v1414_v27, inf  ;;  %v1468_v27 = vand.u32 65535, %v2475_v57 }
 0x2f0   :  { %1420 = vmin.xlane.f32.xlu2 %v1419_v48  ;;  %v1242_v22 = vshll.u32 %v1241_v10, 16 }
 0x2f1   :  { %v1211_v19 = vpop.xlane.xlu2 %1210  ;;  %v1470_v58 = vcvt.s32.f32 %v1468_v27 }
 0x2f2   :  { %v1212_v6 = vcvt.f32.s32 %v1211_v19 }
 0x2f3   :  { %v1225_v30 = vpop.xlane.xlu1 %1224 }
 0x2f4   :  { %v1215_v0 = vadd.s32 %v1214_v61, %v1212_v6  ;;  %v1226_v9 = vcvt.f32.s32 %v1225_v30  ;;  %v1496_v30 = vand.u32 65535, %v2495_v14  ;;  %v1311_v14 = vcvt.f32.s32 %v2509_v41 }
 0x2f5   :  { %v1524_v41 = vand.u32 65535, %v2526_v53 }
 0x2f6   :  { %1560 = vst.msk [vmem:[%s2790_s9 + $0x38] sm:$0xff] %vm1552_vm0, %v1215_v0  ;;  %v1229_v26 = vadd.s32 %v1228_v32, %v1226_v9  ;;  %v1484_v0 = vcvt.s32.f32 %v1482_v40  ;;  %v1297_v9 = vcvt.f32.s32 %v2504_v5  ;;  %v1381_v40 = vcvt.f32.s32 %v2578_v55 }
 0x2f7   :  { %v1526_v60 = vcvt.s32.f32 %v1524_v41  ;;  %v1409_v55 = vcvt.f32.s32 %v2598_v47 }
 0x2f8   :  { %1561 = vst.msk [vmem:[%s2790_s9 + $0x40] sm:$0xff] %vm1552_vm0, %v1229_v26  ;;  %v1298_v10 = vshll.u32 %v1297_v9, 16 }
 0x2f9   :  { %v1410_v9 = vshll.u32 %v1409_v55, 16 }
 0x2fb   :  { %v2624_v4 = vpop.xlane.xlu1 %1430  ;;  %v1239_v7 = vpop.xlane.xlu0 %1238 }
 0x2fc   :  { %v1240_v11 = vcvt.f32.s32 %v1239_v7  ;;  %vm1432_vm8 = vcmp.eq.f32.partialorder %v2445_v24, %v2624_v4  ;;  %v1456_v24 = vcvt.s32.f32 %v1454_v29 }
 0x2fd   :  { %v1433_v21 = vsel %vm1432_vm8, %v1428_v20, inf }
 0x2fe   :  { %v1243_v15 = vadd.s32 %v1242_v22, %v1240_v11  ;;  %1434 = vmin.xlane.f32.xlu0 %v1433_v21  ;;  %v1510_v11 = vand.u32 65535, %v2514_v52 }
 0x2ff   :  { %v2628_v36 = vpop.xlane.xlu2 %1444 }
 0x300   :  { %1562 = vst.msk [vmem:[%s2790_s9 + $0x48] sm:$0xff] %vm1552_vm0, %v1243_v15  ;;  %vm1446_vm9 = vcmp.eq.f32.partialorder %v2452_v59, %v2628_v36  ;;  %v1270_v59 = vshll.u32 %v1269_v37, 16 }
 0x301   :  { %v1447_v34 = vsel %vm1446_vm9, %v1442_v25, inf  ;;  %v1512_v25 = vcvt.s32.f32 %v1510_v11 }
 0x302   :  { %1448 = vmin.xlane.f32.xlu1 %v1447_v34 }
 0x305   :  { %v2637_v16 = vpop.xlane.xlu0 %1458 }
 0x306   :  { %vm1460_vm10 = vcmp.eq.f32.partialorder %v2461_v8, %v2637_v16  ;;  %v1283_v8 = vcvt.f32.s32 %v2479_v2 }
 0x307   :  { %v1461_v45 = vsel %vm1460_vm10, %v1456_v24, inf }
 0x308   :  { %1462 = vmin.xlane.f32.xlu2 %v1461_v45  ;;  %v1284_v19 = vshll.u32 %v1283_v8, 16  ;;  %v1538_v45 = vand.u32 65535, %v2535_v13  ;;  %v1353_v13 = vcvt.f32.s32 %v2553_v12 }
 0x309   :  { %v1253_v31 = vpop.xlane.xlu2 %1252 }
 0x30a   :  { %v1254_v46 = vcvt.f32.s32 %v1253_v31  ;;  %v1339_v31 = vcvt.f32.s32 %v2549_v44 }
 0x30b   :  { %v1267_v1 = vpop.xlane.xlu1 %1266 }
 0x30c   :  { %v1257_v56 = vadd.s32 %v1256_v35, %v1254_v46  ;;  %v1268_v49 = vcvt.f32.s32 %v1267_v1 }
 0x30e   :  { %1563 = vst.msk [vmem:[%s2790_s9 + $0x50] sm:$0xff] %vm1552_vm0, %v1257_v56  ;;  %v1271_v39 = vadd.s32 %v1270_v59, %v1268_v49  ;;  %v1340_v56 = vshll.u32 %v1339_v31, 16 }
 0x310   :  { %1564 = vst.msk [vmem:[%s2790_s9 + $0x58] sm:$0xff] %vm1552_vm0, %v1271_v39 }
 0x313   :  { %v2654_v63 = vpop.xlane.xlu1 %1472  ;;  %v1281_v48 = vpop.xlane.xlu0 %1280 }
 0x314   :  { %v1282_v61 = vcvt.f32.s32 %v1281_v48  ;;  %vm1474_vm11 = vcmp.eq.f32.partialorder %v2484_v54, %v2654_v63  ;;  %v1498_v54 = vcvt.s32.f32 %v1496_v30 }
 0x315   :  { %v1475_v6 = vsel %vm1474_vm11, %v1470_v58, inf }
 0x316   :  { %v1285_v57 = vadd.s32 %v1284_v19, %v1282_v61  ;;  %1476 = vmin.xlane.f32.xlu0 %v1475_v6  ;;  %v1382_v19 = vshll.u32 %v1381_v40, 16 }
 0x317   :  { %v2658_v2 = vpop.xlane.xlu2 %1486 }
 0x318   :  { %1565 = vst.msk [vmem:[%s2790_s9 + $0x60] sm:$0xff] %vm1552_vm0, %v1285_v57  ;;  %vm1488_vm12 = vcmp.eq.f32.partialorder %v2491_v38, %v2658_v2  ;;  %v1312_v38 = vshll.u32 %v1311_v14, 16  ;;  %v1423_v14 = vcvt.f32.s32 %v2607_v43  ;;  %v1451_v43 = vcvt.f32.s32 %v2628_v36 }
 0x319   :  { %v1489_v3 = vsel %vm1488_vm12, %v1484_v0, inf }
 0x31a   :  { %1490 = vmin.xlane.f32.xlu1 %v1489_v3  ;;  %v1424_v47 = vshll.u32 %v1423_v14, 16 }
 0x31d   :  { %v2667_v32 = vpop.xlane.xlu0 %1500 }
 0x31e   :  { %vm1502_vm13 = vcmp.eq.f32.partialorder %v2500_v50, %v2667_v32  ;;  %v1325_v50 = vcvt.f32.s32 %v2518_v51 }
 0x31f   :  { %v1503_v26 = vsel %vm1502_vm13, %v1498_v54, inf }
 0x320   :  { %1504 = vmin.xlane.f32.xlu2 %v1503_v26  ;;  %v1326_v29 = vshll.u32 %v1325_v50, 16  ;;  %v1452_v50 = vshll.u32 %v1451_v43, 16 }
 0x321   :  { %v1295_v17 = vpop.xlane.xlu2 %1294 }
 0x322   :  { %v1296_v18 = vcvt.f32.s32 %v1295_v17 }
 0x323   :  { %v1309_v20 = vpop.xlane.xlu1 %1308 }
 0x324   :  { %v1299_v7 = vadd.s32 %v1298_v10, %v1296_v18  ;;  %v1310_v22 = vcvt.f32.s32 %v1309_v20 }
 0x326   :  { %1566 = vst.msk [vmem:[%s2790_s9 + $0x68] sm:$0xff] %vm1552_vm0, %v1299_v7  ;;  %v1313_v5 = vadd.s32 %v1312_v38, %v1310_v22  ;;  %v1437_v7 = vcvt.f32.s32 %v2624_v4 }
 0x328   :  { %1567 = vst.msk [vmem:[%s2790_s9 + $0x70] sm:$0xff] %vm1552_vm0, %v1313_v5  ;;  %v1438_v38 = vshll.u32 %v1437_v7, 16 }
 0x32b   :  { %v2684_v21 = vpop.xlane.xlu1 %1514  ;;  %v1323_v15 = vpop.xlane.xlu0 %1322 }
 0x32c   :  { %v1324_v34 = vcvt.f32.s32 %v1323_v15  ;;  %vm1516_vm14 = vcmp.eq.f32.partialorder %v2523_v33, %v2684_v21  ;;  %v1540_v33 = vcvt.s32.f32 %v1538_v45  ;;  %v1465_v15 = vcvt.f32.s32 %v2637_v16 }
 0x32d   :  { %v1517_v24 = vsel %vm1516_vm14, %v1512_v25, inf  ;;  %v1493_v16 = vcvt.f32.s32 %v2658_v2 }
 0x32e   :  { %v1327_v52 = vadd.s32 %v1326_v29, %v1324_v34  ;;  %1518 = vmin.xlane.f32.xlu0 %v1517_v24  ;;  %v1466_v36 = vshll.u32 %v1465_v15, 16  ;;  %v1479_v24 = vcvt.f32.s32 %v2654_v63 }
 0x32f   :  { %v2688_v51 = vpop.xlane.xlu2 %1528  ;;  %v1494_v31 = vshll.u32 %v1493_v16, 16 }
 0x330   :  { %1568 = vst.msk [vmem:[%s2790_s9 + $0x78] sm:$0xff] %vm1552_vm0, %v1327_v52  ;;  %vm1530_vm15 = vcmp.eq.f32.partialorder %v2531_v62, %v2688_v51  ;;  %v1354_v62 = vshll.u32 %v1353_v13, 16  ;;  %v1507_v13 = vcvt.f32.s32 %v2667_v32  ;;  %v1535_v32 = vcvt.f32.s32 %v2688_v51 }
 0x331   :  { %v1531_v53 = vsel %vm1530_vm15, %v1526_v60, inf  ;;  %v1480_v60 = vshll.u32 %v1479_v24, 16 }
 0x332   :  { %1532 = vmin.xlane.f32.xlu1 %v1531_v53  ;;  %v1508_v2 = vshll.u32 %v1507_v13, 16 }
 0x335   :  { %v2697_v37 = vpop.xlane.xlu0 %1542 }
 0x336   :  { %vm1544_vm1 = vcmp.eq.f32.partialorder %v2541_v42, %v2697_v37  ;;  %v1367_v42 = vcvt.f32.s32 %v2568_v28  ;;  %v1395_v28 = vcvt.f32.s32 %v2594_v23 }
 0x337   :  { %v1545_v35 = vsel %vm1544_vm1, %v1540_v33, inf }
 0x338   :  { %1546 = vmin.xlane.f32.xlu2 %v1545_v35  ;;  %v1368_v27 = vshll.u32 %v1367_v42, 16  ;;  %v1396_v0 = vshll.u32 %v1395_v28, 16 }
 0x339   :  { %v1337_v46 = vpop.xlane.xlu2 %1336 }
 0x33a   :  { %v1338_v1 = vcvt.f32.s32 %v1337_v46 }
 0x33b   :  { %v1351_v49 = vpop.xlane.xlu1 %1350 }
 0x33c   :  { %v1341_v59 = vadd.s32 %v1340_v56, %v1338_v1  ;;  %v1352_v39 = vcvt.f32.s32 %v1351_v49 }
 0x33e   :  { %1569 = vst.msk [vmem:[%s2790_s9 + $0x80] sm:$0xff] %vm1552_vm0, %v1341_v59  ;;  %v1355_v44 = vadd.s32 %v1354_v62, %v1352_v39  ;;  %v1521_v59 = vcvt.f32.s32 %v2684_v21 }
 0x340   :  { %1570 = vst.msk [vmem:[%s2790_s9 + $0x88] sm:$0xff] %vm1552_vm0, %v1355_v44  ;;  %v1522_v62 = vshll.u32 %v1521_v59, 16 }
 0x345   :  { %v1365_v12 = vpop.xlane.xlu1 %1364 }
 0x346   :  { %v1366_v8 = vcvt.f32.s32 %v1365_v12  ;;  %v1536_v12 = vshll.u32 %v1535_v32, 16 }
 0x348   :  { %v1369_v48 = vadd.s32 %v1368_v27, %v1366_v8  ;;  %v1549_v8 = vcvt.f32.s32 %v2697_v37 }
 0x34a   :  { %1571 = vst.msk [vmem:[%s2790_s9 + $0x90] sm:$0xff] %vm1552_vm0, %v1369_v48  ;;  %v1550_v51 = vshll.u32 %v1549_v8, 16 }
 0x34b   :  { %v1379_v58 = vpop.xlane.xlu2 %1378 }
 0x34c   :  { %v1380_v61 = vcvt.f32.s32 %v1379_v58 }
 0x34e   :  { %v1383_v6 = vadd.s32 %v1382_v19, %v1380_v61 }
 0x350   :  { %1572 = vst.msk [vmem:[%s2790_s9 + $0x98] sm:$0xff] %vm1552_vm0, %v1383_v6 }
 0x359   :  { %v1393_v57 = vpop.xlane.xlu0 %1392 }
 0x35a   :  { %v1394_v30 = vcvt.f32.s32 %v1393_v57 }
 0x35c   :  { %v1397_v3 = vadd.s32 %v1396_v0, %v1394_v30 }
 0x35d   :  { %v1407_v54 = vpop.xlane.xlu1 %1406 }
 0x35e   :  { %1573 = vst.msk [vmem:[%s2790_s9 + $0xa0] sm:$0xff] %vm1552_vm0, %v1397_v3  ;;  %v1408_v26 = vcvt.f32.s32 %v1407_v54 }
 0x360   :  { %v1411_v17 = vadd.s32 %v1410_v9, %v1408_v26 }
 0x362   :  { %1574 = vst.msk [vmem:[%s2790_s9 + $0xa8] sm:$0xff] %vm1552_vm0, %v1411_v17 }
 0x363   :  { %v1421_v23 = vpop.xlane.xlu2 %1420 }
 0x364   :  { %v1422_v10 = vcvt.f32.s32 %v1421_v23 }
 0x366   :  { %v1425_v18 = vadd.s32 %v1424_v47, %v1422_v10 }
 0x368   :  { %1575 = vst.msk [vmem:[%s2790_s9 + $0xb0] sm:$0xff] %vm1552_vm0, %v1425_v18 }
 0x371   :  { %v1435_v20 = vpop.xlane.xlu0 %1434 }
 0x372   :  { %v1436_v22 = vcvt.f32.s32 %v1435_v20 }
 0x374   :  { %v1439_v5 = vadd.s32 %v1438_v38, %v1436_v22 }
 0x375   :  { %v1449_v11 = vpop.xlane.xlu1 %1448 }
 0x376   :  { %1576 = vst.msk [vmem:[%s2790_s9 + $0xb8] sm:$0xff] %vm1552_vm0, %v1439_v5  ;;  %v1450_v41 = vcvt.f32.s32 %v1449_v11 }
 0x378   :  { %v1453_v25 = vadd.s32 %v1452_v50, %v1450_v41 }
 0x37a   :  { %1577 = vst.msk [vmem:[%s2790_s9 + $0xc0] sm:$0xff] %vm1552_vm0, %v1453_v25 }
 0x37b   :  { %v1463_v4 = vpop.xlane.xlu2 %1462 }
 0x37c   :  { %v1464_v29 = vcvt.f32.s32 %v1463_v4 }
 0x37e   :  { %v1467_v34 = vadd.s32 %v1466_v36, %v1464_v29 }
 0x380   :  { %1578 = vst.msk [vmem:[%s2790_s9 + $0xc8] sm:$0xff] %vm1552_vm0, %v1467_v34 }
 0x389   :  { %v1477_v52 = vpop.xlane.xlu0 %1476 }
 0x38a   :  { %v1478_v45 = vcvt.f32.s32 %v1477_v52 }
 0x38c   :  { %v1481_v53 = vadd.s32 %v1480_v60, %v1478_v45 }
 0x38d   :  { %v1491_v33 = vpop.xlane.xlu1 %1490 }
 0x38e   :  { %1579 = vst.msk [vmem:[%s2790_s9 + $0xd0] sm:$0xff] %vm1552_vm0, %v1481_v53  ;;  %v1492_v35 = vcvt.f32.s32 %v1491_v33 }
 0x390   :  { %v1495_v46 = vadd.s32 %v1494_v31, %v1492_v35 }
 0x392   :  { %1580 = vst.msk [vmem:[%s2790_s9 + $0xd8] sm:$0xff] %vm1552_vm0, %v1495_v46 }
 0x393   :  { %v1505_v63 = vpop.xlane.xlu2 %1504 }
 0x394   :  { %v1506_v56 = vcvt.f32.s32 %v1505_v63 }
 0x396   :  { %v1509_v1 = vadd.s32 %v1508_v2, %v1506_v56 }
 0x398   :  { %1581 = vst.msk [vmem:[%s2790_s9 + $0xe0] sm:$0xff] %vm1552_vm0, %v1509_v1 }
 0x3a1   :  { %v1519_v49 = vpop.xlane.xlu0 %1518 }
 0x3a2   :  { %v1520_v39 = vcvt.f32.s32 %v1519_v49 }
 0x3a4   :  { %v1523_v44 = vadd.s32 %v1522_v62, %v1520_v39 }
 0x3a5   :  { %v1533_v42 = vpop.xlane.xlu1 %1532 }
 0x3a6   :  { %1582 = vst.msk [vmem:[%s2790_s9 + $0xe8] sm:$0xff] %vm1552_vm0, %v1523_v44  ;;  %v1534_v27 = vcvt.f32.s32 %v1533_v42 }
 0x3a8   :  { %v1537_v40 = vadd.s32 %v1536_v12, %v1534_v27 }
 0x3aa   :  { %1583 = vst.msk [vmem:[%s2790_s9 + $0xf0] sm:$0xff] %vm1552_vm0, %v1537_v40 }
 0x3ab   :  { %v1547_v21 = vpop.xlane.xlu2 %1546 }
 0x3ac   :  { %v1548_v48 = vcvt.f32.s32 %v1547_v21 }
 0x3ae   :  { %v1551_v58 = vadd.s32 %v1550_v51, %v1548_v48 }
 0x3b0   :  { %1584 = vst.msk [vmem:[%s2790_s9 + $0xf8] sm:$0xff] %vm1552_vm0, %v1551_v58 }
 0x3b1   :  { %1589 = vsyncpa [#allocation3], 1 }
 0x3b2   :  { %1590 = vsyncpa [#allocation5], 1 }
 0x3b3   :  { %1591 = vsyncpa [#allocation8], 1 }
 0x3b4   :  { %1592 = vsyncpa [#allocation11], 1 }

</bundles_post_ra>
